<compile_context>
chip_gen: v7x
topology: tpu7x:2x2x1
jax: 0.10.0
libtpu: 0.0.40
codegen_flags: <defaults>
</compile_context>

<pallas_src>
import jax
import jax.numpy as jnp
from jax.experimental import pallas as pl
from jax.experimental.pallas import tpu as pltpu


# ------------------------------ Fused kernel ---------------------------------

def _make_fused_kernel(num_layers, T, B, H):
    """Builds the fused (num_layers x LSTM) + Linear kernel body."""
    H4 = 4 * H

    def kernel(*refs):
        # refs layout:
        #   x_ref                                   (T*B, D)
        #   layer 0: wih0 (D, 4H), whh0 (H, 4H), b0 (1, 4H)
        #   layer l>=1: wcat_l (2H, 4H) = [W_ih^T ; W_hh^T], b_l (1, 4H)
        #   wdec (H, O), bdec (1, O)
        #   out_ref (T*B, O)
        #   scratch: pre_scr (T*B, 4H), seq_scr (T*B, H)
        x_ref = refs[0]
        wih0_ref, whh0_ref, b0_ref = refs[1], refs[2], refs[3]
        idx = 4
        upper_refs = []
        for _ in range(num_layers - 1):
            upper_refs.append((refs[idx], refs[idx + 1]))
            idx += 2
        wdec_ref, bdec_ref = refs[idx], refs[idx + 1]
        out_ref = refs[idx + 2]
        pre_scr, seq_scr = refs[idx + 3], refs[idx + 4]

        # Layer-0 input projection for all T timesteps at once, hoisted off the
        # serial recurrence: (T*B, D) @ (D, 4H) + bias.
        # TODO(synk): cast MXU operands to bf16 on v6e/v7x once H/B scale up.
        pre_scr[...] = (
            jnp.dot(x_ref[...], wih0_ref[...],
                    preferred_element_type=jnp.float32)
            + b0_ref[...])

        # Hoist weight loads out of the recurrence (single VMEM load each).
        whh0 = whh0_ref[...]
        upper_w = [(w_ref[...], b_ref[...]) for (w_ref, b_ref) in upper_refs]

        # Per-layer recurrent state stays in vregs (NOT VMEM scratch).
        zeros = jnp.zeros((B, H), jnp.float32)
        h = [zeros] * num_layers
        c = [zeros] * num_layers

        def gate_math(gates, c_prev):
            # Single full-width sigmoid on (B, 4H); the g-gate columns of the
            # weights/bias were pre-scaled by 2, so tanh(g) = 2*sigmoid(2g) - 1
            # is just a VPU affine on the g slice.
            sig = jax.nn.sigmoid(gates)
            i_g = sig[:, 0 * H:1 * H]
            f_g = sig[:, 1 * H:2 * H]
            g_g = 2.0 * sig[:, 2 * H:3 * H] - 1.0
            o_g = sig[:, 3 * H:4 * H]
            c_new = f_g * c_prev + i_g * g_g
            h_new = o_g * jnp.tanh(c_new)
            return h_new, c_new

        # Wavefront (diagonal) schedule: at wave w, layer l runs its step
        # t = w - l. Step t of layer l depends only on its own step t-1 and on
        # step t of layer l-1 (computed at wave w-1), so the per-wave bodies of
        # different layers are independent -> ILP across layers hides the MXU /
        # EUP latency of one layer under the other's work.
        # Layers are processed in decreasing order so h[l-1] still holds its
        # previous-wave value when layer l reads it.
        # TODO(synk): for large T, switch the steady-state region to a
        # lax.fori_loop with partial unroll (2-4) to bound instruction memory.
        for w in range(T + num_layers - 1):
            for l in reversed(range(num_layers)):
                t = w - l
                if t < 0 or t >= T:
                    continue
                if l == 0:
                    gates = pre_scr[pl.ds(t * B, B), :] + jnp.dot(
                        h[0], whh0, preferred_element_type=jnp.float32)
                else:
                    wcat, b_l = upper_w[l - 1]
                    # Fused input+hidden projection: one (B, 2H) @ (2H, 4H)
                    # MXU push per step for upper layers.
                    inp = jnp.concatenate([h[l - 1], h[l]], axis=1)
                    gates = jnp.dot(
                        inp, wcat, preferred_element_type=jnp.float32) + b_l
                h_new, c_new = gate_math(gates, c[l])
                h[l] = h_new
                c[l] = c_new
                if l == num_layers - 1:
                    # Only the last layer's outputs are needed (for the
                    # decoder); stores are off the recurrent critical path.
                    seq_scr[pl.ds(t * B, B), :] = h_new

        # Decoder epilogue: (T*B, H) @ (H, O) + b -> single output store.
        # TODO(synk): pad to a 128-lane output slab once output_size grows.
        out_ref[...] = (
            jnp.dot(seq_scr[...], wdec_ref[...],
                    preferred_element_type=jnp.float32)
            + bdec_ref[...]).astype(out_ref.dtype)

    return kernel


# ------------------------- Weight prep (one-time) -----------------------------

def prepare_lstm_params(layer_params, w_dec, b_dec):
    """One-time weight prep, hoisted out of the per-call path.

    layer_params: list of (w_ih (4H, Din), w_hh (4H, H), b_ih (4H,), b_hh (4H,))
      in PyTorch nn.LSTM layout (gate order i, f, g, o).
    Returns (prepped_layers, wdec_t, bdec_row) ready for lstm_model_forward.
    """
    H = layer_params[0][1].shape[1]
    H4 = 4 * H
    # Scale g-gate columns by 2 so the kernel can use tanh(g) = 2*sigmoid(2g)-1.
    gscale = jnp.ones((1, H4), jnp.float32).at[:, 2 * H:3 * H].set(2.0)

    prepped = []
    for l, (w_ih, w_hh, b_ih, b_hh) in enumerate(layer_params):
        wih_t = jnp.transpose(w_ih) * gscale            # (Din, 4H)
        whh_t = jnp.transpose(w_hh) * gscale            # (H, 4H)
        b = (b_ih + b_hh).reshape(1, H4) * gscale       # (1, 4H)
        if l == 0:
            prepped.append((wih_t, whh_t, b))
        else:
            # Fused [W_ih^T ; W_hh^T] for the per-step (B, 2H) @ (2H, 4H) push.
            prepped.append((jnp.concatenate([wih_t, whh_t], axis=0), b))
    wdec_t = jnp.transpose(w_dec)                       # (H, O)
    bdec_row = b_dec.reshape(1, -1)                     # (1, O)
    return tuple(prepped), wdec_t, bdec_row


# ----------------------------- Forward wrapper --------------------------------

def lstm_model_forward(x, prepped_layers, wdec_t, bdec_row):
    """Equivalent of: x, _ = nn.LSTM(...)(x); x = nn.Linear(...)(x).

    x: (T, B, input_size), time-major (PyTorch batch_first=False).
    Returns (T, B, output_size).
    """
    T, B, D = x.shape
    num_layers = len(prepped_layers)
    H = prepped_layers[0][1].shape[0]
    H4 = 4 * H
    O = wdec_t.shape[1]

    x2d = x.reshape(T * B, D)

    def full(shape):
        return pl.BlockSpec(shape, lambda i: (0,) * len(shape))

    args = [x2d]
    in_specs = [full((T * B, D))]
    wih0, whh0, b0 = prepped_layers[0]
    args += [wih0, whh0, b0]
    in_specs += [full((D, H4)), full((H, H4)), full((1, H4))]
    for l in range(1, num_layers):
        wcat, b = prepped_layers[l]
        args += [wcat, b]
        in_specs += [full((2 * H, H4)), full((1, H4))]
    args += [wdec_t, bdec_row]
    in_specs += [full((H, O)), full((1, O))]

    kernel = _make_fused_kernel(num_layers, T, B, H)

    # TODO(synk): add a batch-parallel grid axis for v7x's 2nd TensorCore once
    # B >= 16, and chunk pre_scr over T once T*B*4H f32 approaches VMEM limits.
    out2d = pl.pallas_call(
        kernel,
        out_shape=jax.ShapeDtypeStruct((T * B, O), x.dtype),
        grid_spec=pltpu.PrefetchScalarGridSpec(
            num_scalar_prefetch=0,
            grid=(1,),
            in_specs=in_specs,
            out_specs=full((T * B, O)),
            scratch_shapes=[
                pltpu.VMEM((T * B, H4), jnp.float32),  # hoisted layer-0 gates
                pltpu.VMEM((T * B, H), jnp.float32),   # last-layer h sequence
            ],
        ),
        compiler_params=pltpu.CompilerParams(
            dimension_semantics=("arbitrary",),
        ),
    )(*args)

    return out2d.reshape(T, B, O)


# ----------------------------- Pure-JAX reference -----------------------------

def lstm_model_ref(x, layer_params, w_dec, b_dec):
    h_seq = x
    for (w_ih, w_hh, b_ih, b_hh) in layer_params:
        T, B, _ = h_seq.shape
        H = w_hh.shape[1]

        def step(carry, xt, w_ih=w_ih, w_hh=w_hh, b_ih=b_ih, b_hh=b_hh):
            h, c = carry
            gates = xt @ w_ih.T + h @ w_hh.T + b_ih + b_hh
            i, f, g, o = jnp.split(gates, 4, axis=-1)
            i = jax.nn.sigmoid(i)
            f = jax.nn.sigmoid(f)
            g = jnp.tanh(g)
            o = jax.nn.sigmoid(o)
            c = f * c + i * g
            h = o * jnp.tanh(c)
            return (h, c), h

        init = (jnp.zeros((B, H), x.dtype), jnp.zeros((B, H), x.dtype))
        _, h_seq = jax.lax.scan(step, init, h_seq)
    return h_seq @ w_dec.T + b_dec


# ----------------------------------- Main -------------------------------------

if __name__ == "__main__":
    input_size = 16
    hidden_size = 32
    num_layer = 2
    output_size = 4
    T, B = 8, 8

    key = jax.random.PRNGKey(0)
    scale = 1.0 / jnp.sqrt(hidden_size)   # PyTorch default U(-1/sqrt(H), 1/sqrt(H))

    layer_params = []
    for layer in range(num_layer):
        in_dim = input_size if layer == 0 else hidden_size
        key, k1, k2, k3, k4 = jax.random.split(key, 5)
        w_ih = jax.random.uniform(k1, (4 * hidden_size, in_dim),
                                  jnp.float32, -scale, scale)
        w_hh = jax.random.uniform(k2, (4 * hidden_size, hidden_size),
                                  jnp.float32, -scale, scale)
        b_ih = jax.random.uniform(k3, (4 * hidden_size,),
                                  jnp.float32, -scale, scale)
        b_hh = jax.random.uniform(k4, (4 * hidden_size,),
                                  jnp.float32, -scale, scale)
        layer_params.append((w_ih, w_hh, b_ih, b_hh))

    key, kd1, kd2, kx = jax.random.split(key, 4)
    dec_scale = 1.0 / jnp.sqrt(hidden_size)
    w_dec = jax.random.uniform(kd1, (output_size, hidden_size),
                               jnp.float32, -dec_scale, dec_scale)
    b_dec = jax.random.uniform(kd2, (output_size,),
                               jnp.float32, -dec_scale, dec_scale)

    x = jax.random.normal(kx, (T, B, input_size), jnp.float32)

    # One-time weight prep (transpose / g-scale / bias-sum / fuse) outside jit.
    prepped_layers, wdec_t, bdec_row = prepare_lstm_params(
        layer_params, w_dec, b_dec)
    prepped_layers = jax.block_until_ready(prepped_layers)

    fwd = jax.jit(lstm_model_forward)
    out = fwd(x, prepped_layers, wdec_t, bdec_row)
    out = jax.block_until_ready(out)

    ref = lstm_model_ref(x, layer_params, w_dec, b_dec)
    assert out.shape == (T, B, output_size), out.shape
    assert jnp.allclose(out, ref, atol=1e-5, rtol=1e-5), (
        f"max abs err {jnp.max(jnp.abs(out - ref))}")

    print("KERNEL_OK")
</pallas_src>

<mosaic_0001>
module attributes {stable_mosaic.version = 11 : i64} {
  func.func @kernel(%arg0: i32, %arg1: memref<64x16xf32, #tpu.memory_space<vmem>>, %arg2: memref<16x128xf32, #tpu.memory_space<vmem>>, %arg3: memref<32x128xf32, #tpu.memory_space<vmem>>, %arg4: memref<1x128xf32, #tpu.memory_space<vmem>>, %arg5: memref<64x128xf32, #tpu.memory_space<vmem>>, %arg6: memref<1x128xf32, #tpu.memory_space<vmem>>, %arg7: memref<32x4xf32, #tpu.memory_space<vmem>>, %arg8: memref<1x4xf32, #tpu.memory_space<vmem>>, %arg9: memref<64x4xf32, #tpu.memory_space<vmem>>, %arg10: memref<64x128xf32, #tpu.memory_space<vmem>>, %arg11: memref<64x32xf32, #tpu.memory_space<vmem>>) attributes {dimension_semantics = [#tpu.dimension_semantics<arbitrary>], iteration_bounds = array<i64: 1>, scalar_prefetch = 0 : i64, scratch_operands = 2 : i64, tpu.core_type = #tpu.core_type<tc>, window_params = [{pipeline_mode = #tpu.pipeline_mode<synchronous>, transform_indices = @transform_0, window_bounds = array<i64: 64, 16>}, {pipeline_mode = #tpu.pipeline_mode<synchronous>, transform_indices = @transform_1, window_bounds = array<i64: 16, 128>}, {pipeline_mode = #tpu.pipeline_mode<synchronous>, transform_indices = @transform_2, window_bounds = array<i64: 32, 128>}, {pipeline_mode = #tpu.pipeline_mode<synchronous>, transform_indices = @transform_3, window_bounds = array<i64: 1, 128>}, {pipeline_mode = #tpu.pipeline_mode<synchronous>, transform_indices = @transform_4, window_bounds = array<i64: 64, 128>}, {pipeline_mode = #tpu.pipeline_mode<synchronous>, transform_indices = @transform_5, window_bounds = array<i64: 1, 128>}, {pipeline_mode = #tpu.pipeline_mode<synchronous>, transform_indices = @transform_6, window_bounds = array<i64: 32, 4>}, {pipeline_mode = #tpu.pipeline_mode<synchronous>, transform_indices = @transform_7, window_bounds = array<i64: 1, 4>}, {pipeline_mode = #tpu.pipeline_mode<synchronous>, transform_indices = @transform_8, window_bounds = array<i64: 64, 4>}]} {
    %c0 = arith.constant 0 : index
    %c0_0 = arith.constant 0 : index
    %0 = vector.load %arg1[%c0, %c0_0] : memref<64x16xf32, #tpu.memory_space<vmem>>, vector<64x16xf32>
    %c0_1 = arith.constant 0 : index
    %c0_2 = arith.constant 0 : index
    %1 = vector.load %arg2[%c0_1, %c0_2] : memref<16x128xf32, #tpu.memory_space<vmem>>, vector<16x128xf32>
    %cst = arith.constant dense<0.000000e+00> : vector<64x128xf32>
    %2 = tpu.matmul %0, %1, %cst {dimension_numbers = #tpu.dot_dimension_numbers<[1], [0], [0], [1], [0, 0, 1, 1], [], []>} : vector<64x16xf32>, vector<16x128xf32>, vector<64x128xf32> -> vector<64x128xf32>
    %c0_3 = arith.constant 0 : index
    %c0_4 = arith.constant 0 : index
    %3 = vector.load %arg4[%c0_3, %c0_4] : memref<1x128xf32, #tpu.memory_space<vmem>>, vector<1x128xf32>
    %4 = vector.broadcast %3 : vector<1x128xf32> to vector<64x128xf32>
    %5 = arith.addf %2, %4 : vector<64x128xf32>
    %c0_5 = arith.constant 0 : index
    %c0_6 = arith.constant 0 : index
    %6 = vector.load %arg10[%c0_5, %c0_6] : memref<64x128xf32, #tpu.memory_space<vmem>>, vector<64x128xf32>
    tpu.vector_store %arg10[%c0_5, %c0_6], %5 {strides = array<i32>} : memref<64x128xf32, #tpu.memory_space<vmem>>, vector<64x128xf32>,
    %c0_7 = arith.constant 0 : index
    %c0_8 = arith.constant 0 : index
    %7 = vector.load %arg3[%c0_7, %c0_8] : memref<32x128xf32, #tpu.memory_space<vmem>>, vector<32x128xf32>
    %c0_9 = arith.constant 0 : index
    %c0_10 = arith.constant 0 : index
    %8 = vector.load %arg5[%c0_9, %c0_10] : memref<64x128xf32, #tpu.memory_space<vmem>>, vector<64x128xf32>
    %c0_11 = arith.constant 0 : index
    %c0_12 = arith.constant 0 : index
    %9 = vector.load %arg6[%c0_11, %c0_12] : memref<1x128xf32, #tpu.memory_space<vmem>>, vector<1x128xf32>
    %cst_13 = arith.constant 0.000000e+00 : f32
    %10 = vector.broadcast %cst_13 : f32 to vector<8x32xf32>
    %c0_14 = arith.constant 0 : index
    %c0_15 = arith.constant 0 : index
    %11 = vector.load %arg10[%c0_14, %c0_15] : memref<64x128xf32, #tpu.memory_space<vmem>>, vector<8x128xf32>
    %cst_16 = arith.constant dense<0.000000e+00> : vector<8x128xf32>
    %12 = tpu.matmul %10, %7, %cst_16 {dimension_numbers = #tpu.dot_dimension_numbers<[1], [0], [0], [1], [0, 0, 1, 1], [], []>} : vector<8x32xf32>, vector<32x128xf32>, vector<8x128xf32> -> vector<8x128xf32>
    %13 = arith.addf %11, %12 : vector<8x128xf32>
    %14 = arith.negf %13 : vector<8x128xf32>
    %15 = math.exp %14 : vector<8x128xf32>
    %cst_17 = arith.constant 1.000000e+00 : f32
    %16 = vector.broadcast %cst_17 : f32 to vector<8x128xf32>
    %17 = arith.addf %16, %15 : vector<8x128xf32>
    %18 = arith.divf %16, %17 : vector<8x128xf32>
    %19 = vector.extract_strided_slice %18 {offsets = [0, 0], sizes = [8, 32], strides = [1, 1]} : vector<8x128xf32> to vector<8x32xf32>
    %20 = vector.extract_strided_slice %18 {offsets = [0, 32], sizes = [8, 32], strides = [1, 1]} : vector<8x128xf32> to vector<8x32xf32>
    %21 = vector.extract_strided_slice %18 {offsets = [0, 64], sizes = [8, 32], strides = [1, 1]} : vector<8x128xf32> to vector<8x32xf32>
    %cst_18 = arith.constant 2.000000e+00 : f32
    %22 = vector.broadcast %cst_18 : f32 to vector<8x32xf32>
    %23 = arith.mulf %22, %21 : vector<8x32xf32>
    %cst_19 = arith.constant 1.000000e+00 : f32
    %24 = vector.broadcast %cst_19 : f32 to vector<8x32xf32>
    %25 = arith.subf %23, %24 : vector<8x32xf32>
    %26 = vector.extract_strided_slice %18 {offsets = [0, 96], sizes = [8, 32], strides = [1, 1]} : vector<8x128xf32> to vector<8x32xf32>
    %27 = arith.mulf %20, %10 : vector<8x32xf32>
    %28 = arith.mulf %19, %25 : vector<8x32xf32>
    %29 = arith.addf %27, %28 : vector<8x32xf32>
    %30 = math.tanh %29 : vector<8x32xf32>
    %31 = arith.mulf %26, %30 : vector<8x32xf32>
    %32 = tpu.concatenate %31, %10 in 1 : vector<8x32xf32>, vector<8x32xf32> -> vector<8x64xf32>
    %cst_20 = arith.constant dense<0.000000e+00> : vector<8x128xf32>
    %33 = tpu.matmul %32, %8, %cst_20 {dimension_numbers = #tpu.dot_dimension_numbers<[1], [0], [0], [1], [0, 0, 1, 1], [], []>} : vector<8x64xf32>, vector<64x128xf32>, vector<8x128xf32> -> vector<8x128xf32>
    %34 = vector.broadcast %9 : vector<1x128xf32> to vector<8x128xf32>
    %35 = arith.addf %33, %34 : vector<8x128xf32>
    %36 = arith.negf %35 : vector<8x128xf32>
    %37 = math.exp %36 : vector<8x128xf32>
    %cst_21 = arith.constant 1.000000e+00 : f32
    %38 = vector.broadcast %cst_21 : f32 to vector<8x128xf32>
    %39 = arith.addf %38, %37 : vector<8x128xf32>
    %40 = arith.divf %38, %39 : vector<8x128xf32>
    %41 = vector.extract_strided_slice %40 {offsets = [0, 0], sizes = [8, 32], strides = [1, 1]} : vector<8x128xf32> to vector<8x32xf32>
    %42 = vector.extract_strided_slice %40 {offsets = [0, 32], sizes = [8, 32], strides = [1, 1]} : vector<8x128xf32> to vector<8x32xf32>
    %43 = vector.extract_strided_slice %40 {offsets = [0, 64], sizes = [8, 32], strides = [1, 1]} : vector<8x128xf32> to vector<8x32xf32>
    %cst_22 = arith.constant 2.000000e+00 : f32
    %44 = vector.broadcast %cst_22 : f32 to vector<8x32xf32>
    %45 = arith.mulf %44, %43 : vector<8x32xf32>
    %cst_23 = arith.constant 1.000000e+00 : f32
    %46 = vector.broadcast %cst_23 : f32 to vector<8x32xf32>
    %47 = arith.subf %45, %46 : vector<8x32xf32>
    %48 = vector.extract_strided_slice %40 {offsets = [0, 96], sizes = [8, 32], strides = [1, 1]} : vector<8x128xf32> to vector<8x32xf32>
    %49 = arith.mulf %42, %10 : vector<8x32xf32>
    %50 = arith.mulf %41, %47 : vector<8x32xf32>
    %51 = arith.addf %49, %50 : vector<8x32xf32>
    %52 = math.tanh %51 : vector<8x32xf32>
    %53 = arith.mulf %48, %52 : vector<8x32xf32>
    %c0_24 = arith.constant 0 : index
    %c0_25 = arith.constant 0 : index
    %54 = vector.load %arg11[%c0_24, %c0_25] : memref<64x32xf32, #tpu.memory_space<vmem>>, vector<8x32xf32>
    tpu.vector_store %arg11[%c0_24, %c0_25], %53 {strides = array<i32>} : memref<64x32xf32, #tpu.memory_space<vmem>>, vector<8x32xf32>,
    %c8 = arith.constant 8 : index
    %c0_26 = arith.constant 0 : index
    %55 = vector.load %arg10[%c8, %c0_26] : memref<64x128xf32, #tpu.memory_space<vmem>>, vector<8x128xf32>
    %cst_27 = arith.constant dense<0.000000e+00> : vector<8x128xf32>
    %56 = tpu.matmul %31, %7, %cst_27 {dimension_numbers = #tpu.dot_dimension_numbers<[1], [0], [0], [1], [0, 0, 1, 1], [], []>} : vector<8x32xf32>, vector<32x128xf32>, vector<8x128xf32> -> vector<8x128xf32>
    %57 = arith.addf %55, %56 : vector<8x128xf32>
    %58 = arith.negf %57 : vector<8x128xf32>
    %59 = math.exp %58 : vector<8x128xf32>
    %cst_28 = arith.constant 1.000000e+00 : f32
    %60 = vector.broadcast %cst_28 : f32 to vector<8x128xf32>
    %61 = arith.addf %60, %59 : vector<8x128xf32>
    %62 = arith.divf %60, %61 : vector<8x128xf32>
    %63 = vector.extract_strided_slice %62 {offsets = [0, 0], sizes = [8, 32], strides = [1, 1]} : vector<8x128xf32> to vector<8x32xf32>
    %64 = vector.extract_strided_slice %62 {offsets = [0, 32], sizes = [8, 32], strides = [1, 1]} : vector<8x128xf32> to vector<8x32xf32>
    %65 = vector.extract_strided_slice %62 {offsets = [0, 64], sizes = [8, 32], strides = [1, 1]} : vector<8x128xf32> to vector<8x32xf32>
    %cst_29 = arith.constant 2.000000e+00 : f32
    %66 = vector.broadcast %cst_29 : f32 to vector<8x32xf32>
    %67 = arith.mulf %66, %65 : vector<8x32xf32>
    %cst_30 = arith.constant 1.000000e+00 : f32
    %68 = vector.broadcast %cst_30 : f32 to vector<8x32xf32>
    %69 = arith.subf %67, %68 : vector<8x32xf32>
    %70 = vector.extract_strided_slice %62 {offsets = [0, 96], sizes = [8, 32], strides = [1, 1]} : vector<8x128xf32> to vector<8x32xf32>
    %71 = arith.mulf %64, %29 : vector<8x32xf32>
    %72 = arith.mulf %63, %69 : vector<8x32xf32>
    %73 = arith.addf %71, %72 : vector<8x32xf32>
    %74 = math.tanh %73 : vector<8x32xf32>
    %75 = arith.mulf %70, %74 : vector<8x32xf32>
    %76 = tpu.concatenate %75, %53 in 1 : vector<8x32xf32>, vector<8x32xf32> -> vector<8x64xf32>
    %cst_31 = arith.constant dense<0.000000e+00> : vector<8x128xf32>
    %77 = tpu.matmul %76, %8, %cst_31 {dimension_numbers = #tpu.dot_dimension_numbers<[1], [0], [0], [1], [0, 0, 1, 1], [], []>} : vector<8x64xf32>, vector<64x128xf32>, vector<8x128xf32> -> vector<8x128xf32>
    %78 = vector.broadcast %9 : vector<1x128xf32> to vector<8x128xf32>
    %79 = arith.addf %77, %78 : vector<8x128xf32>
    %80 = arith.negf %79 : vector<8x128xf32>
    %81 = math.exp %80 : vector<8x128xf32>
    %cst_32 = arith.constant 1.000000e+00 : f32
    %82 = vector.broadcast %cst_32 : f32 to vector<8x128xf32>
    %83 = arith.addf %82, %81 : vector<8x128xf32>
    %84 = arith.divf %82, %83 : vector<8x128xf32>
    %85 = vector.extract_strided_slice %84 {offsets = [0, 0], sizes = [8, 32], strides = [1, 1]} : vector<8x128xf32> to vector<8x32xf32>
    %86 = vector.extract_strided_slice %84 {offsets = [0, 32], sizes = [8, 32], strides = [1, 1]} : vector<8x128xf32> to vector<8x32xf32>
    %87 = vector.extract_strided_slice %84 {offsets = [0, 64], sizes = [8, 32], strides = [1, 1]} : vector<8x128xf32> to vector<8x32xf32>
    %cst_33 = arith.constant 2.000000e+00 : f32
    %88 = vector.broadcast %cst_33 : f32 to vector<8x32xf32>
    %89 = arith.mulf %88, %87 : vector<8x32xf32>
    %cst_34 = arith.constant 1.000000e+00 : f32
    %90 = vector.broadcast %cst_34 : f32 to vector<8x32xf32>
    %91 = arith.subf %89, %90 : vector<8x32xf32>
    %92 = vector.extract_strided_slice %84 {offsets = [0, 96], sizes = [8, 32], strides = [1, 1]} : vector<8x128xf32> to vector<8x32xf32>
    %93 = arith.mulf %86, %51 : vector<8x32xf32>
    %94 = arith.mulf %85, %91 : vector<8x32xf32>
    %95 = arith.addf %93, %94 : vector<8x32xf32>
    %96 = math.tanh %95 : vector<8x32xf32>
    %97 = arith.mulf %92, %96 : vector<8x32xf32>
    %c8_35 = arith.constant 8 : index
    %c0_36 = arith.constant 0 : index
    %98 = vector.load %arg11[%c8_35, %c0_36] : memref<64x32xf32, #tpu.memory_space<vmem>>, vector<8x32xf32>
    tpu.vector_store %arg11[%c8_35, %c0_36], %97 {strides = array<i32>} : memref<64x32xf32, #tpu.memory_space<vmem>>, vector<8x32xf32>,
    %c16 = arith.constant 16 : index
    %c0_37 = arith.constant 0 : index
    %99 = vector.load %arg10[%c16, %c0_37] : memref<64x128xf32, #tpu.memory_space<vmem>>, vector<8x128xf32>
    %cst_38 = arith.constant dense<0.000000e+00> : vector<8x128xf32>
    %100 = tpu.matmul %75, %7, %cst_38 {dimension_numbers = #tpu.dot_dimension_numbers<[1], [0], [0], [1], [0, 0, 1, 1], [], []>} : vector<8x32xf32>, vector<32x128xf32>, vector<8x128xf32> -> vector<8x128xf32>
    %101 = arith.addf %99, %100 : vector<8x128xf32>
    %102 = arith.negf %101 : vector<8x128xf32>
    %103 = math.exp %102 : vector<8x128xf32>
    %cst_39 = arith.constant 1.000000e+00 : f32
    %104 = vector.broadcast %cst_39 : f32 to vector<8x128xf32>
    %105 = arith.addf %104, %103 : vector<8x128xf32>
    %106 = arith.divf %104, %105 : vector<8x128xf32>
    %107 = vector.extract_strided_slice %106 {offsets = [0, 0], sizes = [8, 32], strides = [1, 1]} : vector<8x128xf32> to vector<8x32xf32>
    %108 = vector.extract_strided_slice %106 {offsets = [0, 32], sizes = [8, 32], strides = [1, 1]} : vector<8x128xf32> to vector<8x32xf32>
    %109 = vector.extract_strided_slice %106 {offsets = [0, 64], sizes = [8, 32], strides = [1, 1]} : vector<8x128xf32> to vector<8x32xf32>
    %cst_40 = arith.constant 2.000000e+00 : f32
    %110 = vector.broadcast %cst_40 : f32 to vector<8x32xf32>
    %111 = arith.mulf %110, %109 : vector<8x32xf32>
    %cst_41 = arith.constant 1.000000e+00 : f32
    %112 = vector.broadcast %cst_41 : f32 to vector<8x32xf32>
    %113 = arith.subf %111, %112 : vector<8x32xf32>
    %114 = vector.extract_strided_slice %106 {offsets = [0, 96], sizes = [8, 32], strides = [1, 1]} : vector<8x128xf32> to vector<8x32xf32>
    %115 = arith.mulf %108, %73 : vector<8x32xf32>
    %116 = arith.mulf %107, %113 : vector<8x32xf32>
    %117 = arith.addf %115, %116 : vector<8x32xf32>
    %118 = math.tanh %117 : vector<8x32xf32>
    %119 = arith.mulf %114, %118 : vector<8x32xf32>
    %120 = tpu.concatenate %119, %97 in 1 : vector<8x32xf32>, vector<8x32xf32> -> vector<8x64xf32>
    %cst_42 = arith.constant dense<0.000000e+00> : vector<8x128xf32>
    %121 = tpu.matmul %120, %8, %cst_42 {dimension_numbers = #tpu.dot_dimension_numbers<[1], [0], [0], [1], [0, 0, 1, 1], [], []>} : vector<8x64xf32>, vector<64x128xf32>, vector<8x128xf32> -> vector<8x128xf32>
    %122 = vector.broadcast %9 : vector<1x128xf32> to vector<8x128xf32>
    %123 = arith.addf %121, %122 : vector<8x128xf32>
    %124 = arith.negf %123 : vector<8x128xf32>
    %125 = math.exp %124 : vector<8x128xf32>
    %cst_43 = arith.constant 1.000000e+00 : f32
    %126 = vector.broadcast %cst_43 : f32 to vector<8x128xf32>
    %127 = arith.addf %126, %125 : vector<8x128xf32>
    %128 = arith.divf %126, %127 : vector<8x128xf32>
    %129 = vector.extract_strided_slice %128 {offsets = [0, 0], sizes = [8, 32], strides = [1, 1]} : vector<8x128xf32> to vector<8x32xf32>
    %130 = vector.extract_strided_slice %128 {offsets = [0, 32], sizes = [8, 32], strides = [1, 1]} : vector<8x128xf32> to vector<8x32xf32>
    %131 = vector.extract_strided_slice %128 {offsets = [0, 64], sizes = [8, 32], strides = [1, 1]} : vector<8x128xf32> to vector<8x32xf32>
    %cst_44 = arith.constant 2.000000e+00 : f32
    %132 = vector.broadcast %cst_44 : f32 to vector<8x32xf32>
    %133 = arith.mulf %132, %131 : vector<8x32xf32>
    %cst_45 = arith.constant 1.000000e+00 : f32
    %134 = vector.broadcast %cst_45 : f32 to vector<8x32xf32>
    %135 = arith.subf %133, %134 : vector<8x32xf32>
    %136 = vector.extract_strided_slice %128 {offsets = [0, 96], sizes = [8, 32], strides = [1, 1]} : vector<8x128xf32> to vector<8x32xf32>
    %137 = arith.mulf %130, %95 : vector<8x32xf32>
    %138 = arith.mulf %129, %135 : vector<8x32xf32>
    %139 = arith.addf %137, %138 : vector<8x32xf32>
    %140 = math.tanh %139 : vector<8x32xf32>
    %141 = arith.mulf %136, %140 : vector<8x32xf32>
    %c16_46 = arith.constant 16 : index
    %c0_47 = arith.constant 0 : index
    %142 = vector.load %arg11[%c16_46, %c0_47] : memref<64x32xf32, #tpu.memory_space<vmem>>, vector<8x32xf32>
    tpu.vector_store %arg11[%c16_46, %c0_47], %141 {strides = array<i32>} : memref<64x32xf32, #tpu.memory_space<vmem>>, vector<8x32xf32>,
    %c24 = arith.constant 24 : index
    %c0_48 = arith.constant 0 : index
    %143 = vector.load %arg10[%c24, %c0_48] : memref<64x128xf32, #tpu.memory_space<vmem>>, vector<8x128xf32>
    %cst_49 = arith.constant dense<0.000000e+00> : vector<8x128xf32>
    %144 = tpu.matmul %119, %7, %cst_49 {dimension_numbers = #tpu.dot_dimension_numbers<[1], [0], [0], [1], [0, 0, 1, 1], [], []>} : vector<8x32xf32>, vector<32x128xf32>, vector<8x128xf32> -> vector<8x128xf32>
    %145 = arith.addf %143, %144 : vector<8x128xf32>
    %146 = arith.negf %145 : vector<8x128xf32>
    %147 = math.exp %146 : vector<8x128xf32>
    %cst_50 = arith.constant 1.000000e+00 : f32
    %148 = vector.broadcast %cst_50 : f32 to vector<8x128xf32>
    %149 = arith.addf %148, %147 : vector<8x128xf32>
    %150 = arith.divf %148, %149 : vector<8x128xf32>
    %151 = vector.extract_strided_slice %150 {offsets = [0, 0], sizes = [8, 32], strides = [1, 1]} : vector<8x128xf32> to vector<8x32xf32>
    %152 = vector.extract_strided_slice %150 {offsets = [0, 32], sizes = [8, 32], strides = [1, 1]} : vector<8x128xf32> to vector<8x32xf32>
    %153 = vector.extract_strided_slice %150 {offsets = [0, 64], sizes = [8, 32], strides = [1, 1]} : vector<8x128xf32> to vector<8x32xf32>
    %cst_51 = arith.constant 2.000000e+00 : f32
    %154 = vector.broadcast %cst_51 : f32 to vector<8x32xf32>
    %155 = arith.mulf %154, %153 : vector<8x32xf32>
    %cst_52 = arith.constant 1.000000e+00 : f32
    %156 = vector.broadcast %cst_52 : f32 to vector<8x32xf32>
    %157 = arith.subf %155, %156 : vector<8x32xf32>
    %158 = vector.extract_strided_slice %150 {offsets = [0, 96], sizes = [8, 32], strides = [1, 1]} : vector<8x128xf32> to vector<8x32xf32>
    %159 = arith.mulf %152, %117 : vector<8x32xf32>
    %160 = arith.mulf %151, %157 : vector<8x32xf32>
    %161 = arith.addf %159, %160 : vector<8x32xf32>
    %162 = math.tanh %161 : vector<8x32xf32>
    %163 = arith.mulf %158, %162 : vector<8x32xf32>
    %164 = tpu.concatenate %163, %141 in 1 : vector<8x32xf32>, vector<8x32xf32> -> vector<8x64xf32>
    %cst_53 = arith.constant dense<0.000000e+00> : vector<8x128xf32>
    %165 = tpu.matmul %164, %8, %cst_53 {dimension_numbers = #tpu.dot_dimension_numbers<[1], [0], [0], [1], [0, 0, 1, 1], [], []>} : vector<8x64xf32>, vector<64x128xf32>, vector<8x128xf32> -> vector<8x128xf32>
    %166 = vector.broadcast %9 : vector<1x128xf32> to vector<8x128xf32>
    %167 = arith.addf %165, %166 : vector<8x128xf32>
    %168 = arith.negf %167 : vector<8x128xf32>
    %169 = math.exp %168 : vector<8x128xf32>
    %cst_54 = arith.constant 1.000000e+00 : f32
    %170 = vector.broadcast %cst_54 : f32 to vector<8x128xf32>
    %171 = arith.addf %170, %169 : vector<8x128xf32>
    %172 = arith.divf %170, %171 : vector<8x128xf32>
    %173 = vector.extract_strided_slice %172 {offsets = [0, 0], sizes = [8, 32], strides = [1, 1]} : vector<8x128xf32> to vector<8x32xf32>
    %174 = vector.extract_strided_slice %172 {offsets = [0, 32], sizes = [8, 32], strides = [1, 1]} : vector<8x128xf32> to vector<8x32xf32>
    %175 = vector.extract_strided_slice %172 {offsets = [0, 64], sizes = [8, 32], strides = [1, 1]} : vector<8x128xf32> to vector<8x32xf32>
    %cst_55 = arith.constant 2.000000e+00 : f32
    %176 = vector.broadcast %cst_55 : f32 to vector<8x32xf32>
    %177 = arith.mulf %176, %175 : vector<8x32xf32>
    %cst_56 = arith.constant 1.000000e+00 : f32
    %178 = vector.broadcast %cst_56 : f32 to vector<8x32xf32>
    %179 = arith.subf %177, %178 : vector<8x32xf32>
    %180 = vector.extract_strided_slice %172 {offsets = [0, 96], sizes = [8, 32], strides = [1, 1]} : vector<8x128xf32> to vector<8x32xf32>
    %181 = arith.mulf %174, %139 : vector<8x32xf32>
    %182 = arith.mulf %173, %179 : vector<8x32xf32>
    %183 = arith.addf %181, %182 : vector<8x32xf32>
    %184 = math.tanh %183 : vector<8x32xf32>
    %185 = arith.mulf %180, %184 : vector<8x32xf32>
    %c24_57 = arith.constant 24 : index
    %c0_58 = arith.constant 0 : index
    %186 = vector.load %arg11[%c24_57, %c0_58] : memref<64x32xf32, #tpu.memory_space<vmem>>, vector<8x32xf32>
    tpu.vector_store %arg11[%c24_57, %c0_58], %185 {strides = array<i32>} : memref<64x32xf32, #tpu.memory_space<vmem>>, vector<8x32xf32>,
    %c32 = arith.constant 32 : index
    %c0_59 = arith.constant 0 : index
    %187 = vector.load %arg10[%c32, %c0_59] : memref<64x128xf32, #tpu.memory_space<vmem>>, vector<8x128xf32>
    %cst_60 = arith.constant dense<0.000000e+00> : vector<8x128xf32>
    %188 = tpu.matmul %163, %7, %cst_60 {dimension_numbers = #tpu.dot_dimension_numbers<[1], [0], [0], [1], [0, 0, 1, 1], [], []>} : vector<8x32xf32>, vector<32x128xf32>, vector<8x128xf32> -> vector<8x128xf32>
    %189 = arith.addf %187, %188 : vector<8x128xf32>
    %190 = arith.negf %189 : vector<8x128xf32>
    %191 = math.exp %190 : vector<8x128xf32>
    %cst_61 = arith.constant 1.000000e+00 : f32
    %192 = vector.broadcast %cst_61 : f32 to vector<8x128xf32>
    %193 = arith.addf %192, %191 : vector<8x128xf32>
    %194 = arith.divf %192, %193 : vector<8x128xf32>
    %195 = vector.extract_strided_slice %194 {offsets = [0, 0], sizes = [8, 32], strides = [1, 1]} : vector<8x128xf32> to vector<8x32xf32>
    %196 = vector.extract_strided_slice %194 {offsets = [0, 32], sizes = [8, 32], strides = [1, 1]} : vector<8x128xf32> to vector<8x32xf32>
    %197 = vector.extract_strided_slice %194 {offsets = [0, 64], sizes = [8, 32], strides = [1, 1]} : vector<8x128xf32> to vector<8x32xf32>
    %cst_62 = arith.constant 2.000000e+00 : f32
    %198 = vector.broadcast %cst_62 : f32 to vector<8x32xf32>
    %199 = arith.mulf %198, %197 : vector<8x32xf32>
    %cst_63 = arith.constant 1.000000e+00 : f32
    %200 = vector.broadcast %cst_63 : f32 to vector<8x32xf32>
    %201 = arith.subf %199, %200 : vector<8x32xf32>
    %202 = vector.extract_strided_slice %194 {offsets = [0, 96], sizes = [8, 32], strides = [1, 1]} : vector<8x128xf32> to vector<8x32xf32>
    %203 = arith.mulf %196, %161 : vector<8x32xf32>
    %204 = arith.mulf %195, %201 : vector<8x32xf32>
    %205 = arith.addf %203, %204 : vector<8x32xf32>
    %206 = math.tanh %205 : vector<8x32xf32>
    %207 = arith.mulf %202, %206 : vector<8x32xf32>
    %208 = tpu.concatenate %207, %185 in 1 : vector<8x32xf32>, vector<8x32xf32> -> vector<8x64xf32>
    %cst_64 = arith.constant dense<0.000000e+00> : vector<8x128xf32>
    %209 = tpu.matmul %208, %8, %cst_64 {dimension_numbers = #tpu.dot_dimension_numbers<[1], [0], [0], [1], [0, 0, 1, 1], [], []>} : vector<8x64xf32>, vector<64x128xf32>, vector<8x128xf32> -> vector<8x128xf32>
    %210 = vector.broadcast %9 : vector<1x128xf32> to vector<8x128xf32>
    %211 = arith.addf %209, %210 : vector<8x128xf32>
    %212 = arith.negf %211 : vector<8x128xf32>
    %213 = math.exp %212 : vector<8x128xf32>
    %cst_65 = arith.constant 1.000000e+00 : f32
    %214 = vector.broadcast %cst_65 : f32 to vector<8x128xf32>
    %215 = arith.addf %214, %213 : vector<8x128xf32>
    %216 = arith.divf %214, %215 : vector<8x128xf32>
    %217 = vector.extract_strided_slice %216 {offsets = [0, 0], sizes = [8, 32], strides = [1, 1]} : vector<8x128xf32> to vector<8x32xf32>
    %218 = vector.extract_strided_slice %216 {offsets = [0, 32], sizes = [8, 32], strides = [1, 1]} : vector<8x128xf32> to vector<8x32xf32>
    %219 = vector.extract_strided_slice %216 {offsets = [0, 64], sizes = [8, 32], strides = [1, 1]} : vector<8x128xf32> to vector<8x32xf32>
    %cst_66 = arith.constant 2.000000e+00 : f32
    %220 = vector.broadcast %cst_66 : f32 to vector<8x32xf32>
    %221 = arith.mulf %220, %219 : vector<8x32xf32>
    %cst_67 = arith.constant 1.000000e+00 : f32
    %222 = vector.broadcast %cst_67 : f32 to vector<8x32xf32>
    %223 = arith.subf %221, %222 : vector<8x32xf32>
    %224 = vector.extract_strided_slice %216 {offsets = [0, 96], sizes = [8, 32], strides = [1, 1]} : vector<8x128xf32> to vector<8x32xf32>
    %225 = arith.mulf %218, %183 : vector<8x32xf32>
    %226 = arith.mulf %217, %223 : vector<8x32xf32>
    %227 = arith.addf %225, %226 : vector<8x32xf32>
    %228 = math.tanh %227 : vector<8x32xf32>
    %229 = arith.mulf %224, %228 : vector<8x32xf32>
    %c32_68 = arith.constant 32 : index
    %c0_69 = arith.constant 0 : index
    %230 = vector.load %arg11[%c32_68, %c0_69] : memref<64x32xf32, #tpu.memory_space<vmem>>, vector<8x32xf32>
    tpu.vector_store %arg11[%c32_68, %c0_69], %229 {strides = array<i32>} : memref<64x32xf32, #tpu.memory_space<vmem>>, vector<8x32xf32>,
    %c40 = arith.constant 40 : index
    %c0_70 = arith.constant 0 : index
    %231 = vector.load %arg10[%c40, %c0_70] : memref<64x128xf32, #tpu.memory_space<vmem>>, vector<8x128xf32>
    %cst_71 = arith.constant dense<0.000000e+00> : vector<8x128xf32>
    %232 = tpu.matmul %207, %7, %cst_71 {dimension_numbers = #tpu.dot_dimension_numbers<[1], [0], [0], [1], [0, 0, 1, 1], [], []>} : vector<8x32xf32>, vector<32x128xf32>, vector<8x128xf32> -> vector<8x128xf32>
    %233 = arith.addf %231, %232 : vector<8x128xf32>
    %234 = arith.negf %233 : vector<8x128xf32>
    %235 = math.exp %234 : vector<8x128xf32>
    %cst_72 = arith.constant 1.000000e+00 : f32
    %236 = vector.broadcast %cst_72 : f32 to vector<8x128xf32>
    %237 = arith.addf %236, %235 : vector<8x128xf32>
    %238 = arith.divf %236, %237 : vector<8x128xf32>
    %239 = vector.extract_strided_slice %238 {offsets = [0, 0], sizes = [8, 32], strides = [1, 1]} : vector<8x128xf32> to vector<8x32xf32>
    %240 = vector.extract_strided_slice %238 {offsets = [0, 32], sizes = [8, 32], strides = [1, 1]} : vector<8x128xf32> to vector<8x32xf32>
    %241 = vector.extract_strided_slice %238 {offsets = [0, 64], sizes = [8, 32], strides = [1, 1]} : vector<8x128xf32> to vector<8x32xf32>
    %cst_73 = arith.constant 2.000000e+00 : f32
    %242 = vector.broadcast %cst_73 : f32 to vector<8x32xf32>
    %243 = arith.mulf %242, %241 : vector<8x32xf32>
    %cst_74 = arith.constant 1.000000e+00 : f32
    %244 = vector.broadcast %cst_74 : f32 to vector<8x32xf32>
    %245 = arith.subf %243, %244 : vector<8x32xf32>
    %246 = vector.extract_strided_slice %238 {offsets = [0, 96], sizes = [8, 32], strides = [1, 1]} : vector<8x128xf32> to vector<8x32xf32>
    %247 = arith.mulf %240, %205 : vector<8x32xf32>
    %248 = arith.mulf %239, %245 : vector<8x32xf32>
    %249 = arith.addf %247, %248 : vector<8x32xf32>
    %250 = math.tanh %249 : vector<8x32xf32>
    %251 = arith.mulf %246, %250 : vector<8x32xf32>
    %252 = tpu.concatenate %251, %229 in 1 : vector<8x32xf32>, vector<8x32xf32> -> vector<8x64xf32>
    %cst_75 = arith.constant dense<0.000000e+00> : vector<8x128xf32>
    %253 = tpu.matmul %252, %8, %cst_75 {dimension_numbers = #tpu.dot_dimension_numbers<[1], [0], [0], [1], [0, 0, 1, 1], [], []>} : vector<8x64xf32>, vector<64x128xf32>, vector<8x128xf32> -> vector<8x128xf32>
    %254 = vector.broadcast %9 : vector<1x128xf32> to vector<8x128xf32>
    %255 = arith.addf %253, %254 : vector<8x128xf32>
    %256 = arith.negf %255 : vector<8x128xf32>
    %257 = math.exp %256 : vector<8x128xf32>
    %cst_76 = arith.constant 1.000000e+00 : f32
    %258 = vector.broadcast %cst_76 : f32 to vector<8x128xf32>
    %259 = arith.addf %258, %257 : vector<8x128xf32>
    %260 = arith.divf %258, %259 : vector<8x128xf32>
    %261 = vector.extract_strided_slice %260 {offsets = [0, 0], sizes = [8, 32], strides = [1, 1]} : vector<8x128xf32> to vector<8x32xf32>
    %262 = vector.extract_strided_slice %260 {offsets = [0, 32], sizes = [8, 32], strides = [1, 1]} : vector<8x128xf32> to vector<8x32xf32>
    %263 = vector.extract_strided_slice %260 {offsets = [0, 64], sizes = [8, 32], strides = [1, 1]} : vector<8x128xf32> to vector<8x32xf32>
    %cst_77 = arith.constant 2.000000e+00 : f32
    %264 = vector.broadcast %cst_77 : f32 to vector<8x32xf32>
    %265 = arith.mulf %264, %263 : vector<8x32xf32>
    %cst_78 = arith.constant 1.000000e+00 : f32
    %266 = vector.broadcast %cst_78 : f32 to vector<8x32xf32>
    %267 = arith.subf %265, %266 : vector<8x32xf32>
    %268 = vector.extract_strided_slice %260 {offsets = [0, 96], sizes = [8, 32], strides = [1, 1]} : vector<8x128xf32> to vector<8x32xf32>
    %269 = arith.mulf %262, %227 : vector<8x32xf32>
    %270 = arith.mulf %261, %267 : vector<8x32xf32>
    %271 = arith.addf %269, %270 : vector<8x32xf32>
    %272 = math.tanh %271 : vector<8x32xf32>
    %273 = arith.mulf %268, %272 : vector<8x32xf32>
    %c40_79 = arith.constant 40 : index
    %c0_80 = arith.constant 0 : index
    %274 = vector.load %arg11[%c40_79, %c0_80] : memref<64x32xf32, #tpu.memory_space<vmem>>, vector<8x32xf32>
    tpu.vector_store %arg11[%c40_79, %c0_80], %273 {strides = array<i32>} : memref<64x32xf32, #tpu.memory_space<vmem>>, vector<8x32xf32>,
    %c48 = arith.constant 48 : index
    %c0_81 = arith.constant 0 : index
    %275 = vector.load %arg10[%c48, %c0_81] : memref<64x128xf32, #tpu.memory_space<vmem>>, vector<8x128xf32>
    %cst_82 = arith.constant dense<0.000000e+00> : vector<8x128xf32>
    %276 = tpu.matmul %251, %7, %cst_82 {dimension_numbers = #tpu.dot_dimension_numbers<[1], [0], [0], [1], [0, 0, 1, 1], [], []>} : vector<8x32xf32>, vector<32x128xf32>, vector<8x128xf32> -> vector<8x128xf32>
    %277 = arith.addf %275, %276 : vector<8x128xf32>
    %278 = arith.negf %277 : vector<8x128xf32>
    %279 = math.exp %278 : vector<8x128xf32>
    %cst_83 = arith.constant 1.000000e+00 : f32
    %280 = vector.broadcast %cst_83 : f32 to vector<8x128xf32>
    %281 = arith.addf %280, %279 : vector<8x128xf32>
    %282 = arith.divf %280, %281 : vector<8x128xf32>
    %283 = vector.extract_strided_slice %282 {offsets = [0, 0], sizes = [8, 32], strides = [1, 1]} : vector<8x128xf32> to vector<8x32xf32>
    %284 = vector.extract_strided_slice %282 {offsets = [0, 32], sizes = [8, 32], strides = [1, 1]} : vector<8x128xf32> to vector<8x32xf32>
    %285 = vector.extract_strided_slice %282 {offsets = [0, 64], sizes = [8, 32], strides = [1, 1]} : vector<8x128xf32> to vector<8x32xf32>
    %cst_84 = arith.constant 2.000000e+00 : f32
    %286 = vector.broadcast %cst_84 : f32 to vector<8x32xf32>
    %287 = arith.mulf %286, %285 : vector<8x32xf32>
    %cst_85 = arith.constant 1.000000e+00 : f32
    %288 = vector.broadcast %cst_85 : f32 to vector<8x32xf32>
    %289 = arith.subf %287, %288 : vector<8x32xf32>
    %290 = vector.extract_strided_slice %282 {offsets = [0, 96], sizes = [8, 32], strides = [1, 1]} : vector<8x128xf32> to vector<8x32xf32>
    %291 = arith.mulf %284, %249 : vector<8x32xf32>
    %292 = arith.mulf %283, %289 : vector<8x32xf32>
    %293 = arith.addf %291, %292 : vector<8x32xf32>
    %294 = math.tanh %293 : vector<8x32xf32>
    %295 = arith.mulf %290, %294 : vector<8x32xf32>
    %296 = tpu.concatenate %295, %273 in 1 : vector<8x32xf32>, vector<8x32xf32> -> vector<8x64xf32>
    %cst_86 = arith.constant dense<0.000000e+00> : vector<8x128xf32>
    %297 = tpu.matmul %296, %8, %cst_86 {dimension_numbers = #tpu.dot_dimension_numbers<[1], [0], [0], [1], [0, 0, 1, 1], [], []>} : vector<8x64xf32>, vector<64x128xf32>, vector<8x128xf32> -> vector<8x128xf32>
    %298 = vector.broadcast %9 : vector<1x128xf32> to vector<8x128xf32>
    %299 = arith.addf %297, %298 : vector<8x128xf32>
    %300 = arith.negf %299 : vector<8x128xf32>
    %301 = math.exp %300 : vector<8x128xf32>
    %cst_87 = arith.constant 1.000000e+00 : f32
    %302 = vector.broadcast %cst_87 : f32 to vector<8x128xf32>
    %303 = arith.addf %302, %301 : vector<8x128xf32>
    %304 = arith.divf %302, %303 : vector<8x128xf32>
    %305 = vector.extract_strided_slice %304 {offsets = [0, 0], sizes = [8, 32], strides = [1, 1]} : vector<8x128xf32> to vector<8x32xf32>
    %306 = vector.extract_strided_slice %304 {offsets = [0, 32], sizes = [8, 32], strides = [1, 1]} : vector<8x128xf32> to vector<8x32xf32>
    %307 = vector.extract_strided_slice %304 {offsets = [0, 64], sizes = [8, 32], strides = [1, 1]} : vector<8x128xf32> to vector<8x32xf32>
    %cst_88 = arith.constant 2.000000e+00 : f32
    %308 = vector.broadcast %cst_88 : f32 to vector<8x32xf32>
    %309 = arith.mulf %308, %307 : vector<8x32xf32>
    %cst_89 = arith.constant 1.000000e+00 : f32
    %310 = vector.broadcast %cst_89 : f32 to vector<8x32xf32>
    %311 = arith.subf %309, %310 : vector<8x32xf32>
    %312 = vector.extract_strided_slice %304 {offsets = [0, 96], sizes = [8, 32], strides = [1, 1]} : vector<8x128xf32> to vector<8x32xf32>
    %313 = arith.mulf %306, %271 : vector<8x32xf32>
    %314 = arith.mulf %305, %311 : vector<8x32xf32>
    %315 = arith.addf %313, %314 : vector<8x32xf32>
    %316 = math.tanh %315 : vector<8x32xf32>
    %317 = arith.mulf %312, %316 : vector<8x32xf32>
    %c48_90 = arith.constant 48 : index
    %c0_91 = arith.constant 0 : index
    %318 = vector.load %arg11[%c48_90, %c0_91] : memref<64x32xf32, #tpu.memory_space<vmem>>, vector<8x32xf32>
    tpu.vector_store %arg11[%c48_90, %c0_91], %317 {strides = array<i32>} : memref<64x32xf32, #tpu.memory_space<vmem>>, vector<8x32xf32>,
    %c56 = arith.constant 56 : index
    %c0_92 = arith.constant 0 : index
    %319 = vector.load %arg10[%c56, %c0_92] : memref<64x128xf32, #tpu.memory_space<vmem>>, vector<8x128xf32>
    %cst_93 = arith.constant dense<0.000000e+00> : vector<8x128xf32>
    %320 = tpu.matmul %295, %7, %cst_93 {dimension_numbers = #tpu.dot_dimension_numbers<[1], [0], [0], [1], [0, 0, 1, 1], [], []>} : vector<8x32xf32>, vector<32x128xf32>, vector<8x128xf32> -> vector<8x128xf32>
    %321 = arith.addf %319, %320 : vector<8x128xf32>
    %322 = arith.negf %321 : vector<8x128xf32>
    %323 = math.exp %322 : vector<8x128xf32>
    %cst_94 = arith.constant 1.000000e+00 : f32
    %324 = vector.broadcast %cst_94 : f32 to vector<8x128xf32>
    %325 = arith.addf %324, %323 : vector<8x128xf32>
    %326 = arith.divf %324, %325 : vector<8x128xf32>
    %327 = vector.extract_strided_slice %326 {offsets = [0, 0], sizes = [8, 32], strides = [1, 1]} : vector<8x128xf32> to vector<8x32xf32>
    %328 = vector.extract_strided_slice %326 {offsets = [0, 32], sizes = [8, 32], strides = [1, 1]} : vector<8x128xf32> to vector<8x32xf32>
    %329 = vector.extract_strided_slice %326 {offsets = [0, 64], sizes = [8, 32], strides = [1, 1]} : vector<8x128xf32> to vector<8x32xf32>
    %cst_95 = arith.constant 2.000000e+00 : f32
    %330 = vector.broadcast %cst_95 : f32 to vector<8x32xf32>
    %331 = arith.mulf %330, %329 : vector<8x32xf32>
    %cst_96 = arith.constant 1.000000e+00 : f32
    %332 = vector.broadcast %cst_96 : f32 to vector<8x32xf32>
    %333 = arith.subf %331, %332 : vector<8x32xf32>
    %334 = vector.extract_strided_slice %326 {offsets = [0, 96], sizes = [8, 32], strides = [1, 1]} : vector<8x128xf32> to vector<8x32xf32>
    %335 = arith.mulf %328, %293 : vector<8x32xf32>
    %336 = arith.mulf %327, %333 : vector<8x32xf32>
    %337 = arith.addf %335, %336 : vector<8x32xf32>
    %338 = math.tanh %337 : vector<8x32xf32>
    %339 = arith.mulf %334, %338 : vector<8x32xf32>
    %340 = tpu.concatenate %339, %317 in 1 : vector<8x32xf32>, vector<8x32xf32> -> vector<8x64xf32>
    %cst_97 = arith.constant dense<0.000000e+00> : vector<8x128xf32>
    %341 = tpu.matmul %340, %8, %cst_97 {dimension_numbers = #tpu.dot_dimension_numbers<[1], [0], [0], [1], [0, 0, 1, 1], [], []>} : vector<8x64xf32>, vector<64x128xf32>, vector<8x128xf32> -> vector<8x128xf32>
    %342 = vector.broadcast %9 : vector<1x128xf32> to vector<8x128xf32>
    %343 = arith.addf %341, %342 : vector<8x128xf32>
    %344 = arith.negf %343 : vector<8x128xf32>
    %345 = math.exp %344 : vector<8x128xf32>
    %cst_98 = arith.constant 1.000000e+00 : f32
    %346 = vector.broadcast %cst_98 : f32 to vector<8x128xf32>
    %347 = arith.addf %346, %345 : vector<8x128xf32>
    %348 = arith.divf %346, %347 : vector<8x128xf32>
    %349 = vector.extract_strided_slice %348 {offsets = [0, 0], sizes = [8, 32], strides = [1, 1]} : vector<8x128xf32> to vector<8x32xf32>
    %350 = vector.extract_strided_slice %348 {offsets = [0, 32], sizes = [8, 32], strides = [1, 1]} : vector<8x128xf32> to vector<8x32xf32>
    %351 = vector.extract_strided_slice %348 {offsets = [0, 64], sizes = [8, 32], strides = [1, 1]} : vector<8x128xf32> to vector<8x32xf32>
    %cst_99 = arith.constant 2.000000e+00 : f32
    %352 = vector.broadcast %cst_99 : f32 to vector<8x32xf32>
    %353 = arith.mulf %352, %351 : vector<8x32xf32>
    %cst_100 = arith.constant 1.000000e+00 : f32
    %354 = vector.broadcast %cst_100 : f32 to vector<8x32xf32>
    %355 = arith.subf %353, %354 : vector<8x32xf32>
    %356 = vector.extract_strided_slice %348 {offsets = [0, 96], sizes = [8, 32], strides = [1, 1]} : vector<8x128xf32> to vector<8x32xf32>
    %357 = arith.mulf %350, %315 : vector<8x32xf32>
    %358 = arith.mulf %349, %355 : vector<8x32xf32>
    %359 = arith.addf %357, %358 : vector<8x32xf32>
    %360 = math.tanh %359 : vector<8x32xf32>
    %361 = arith.mulf %356, %360 : vector<8x32xf32>
    %c56_101 = arith.constant 56 : index
    %c0_102 = arith.constant 0 : index
    %362 = vector.load %arg11[%c56_101, %c0_102] : memref<64x32xf32, #tpu.memory_space<vmem>>, vector<8x32xf32>
    tpu.vector_store %arg11[%c56_101, %c0_102], %361 {strides = array<i32>} : memref<64x32xf32, #tpu.memory_space<vmem>>, vector<8x32xf32>,
    %c0_103 = arith.constant 0 : index
    %c0_104 = arith.constant 0 : index
    %363 = vector.load %arg11[%c0_103, %c0_104] : memref<64x32xf32, #tpu.memory_space<vmem>>, vector<64x32xf32>
    %c0_105 = arith.constant 0 : index
    %c0_106 = arith.constant 0 : index
    %364 = vector.load %arg7[%c0_105, %c0_106] : memref<32x4xf32, #tpu.memory_space<vmem>>, vector<32x4xf32>
    %cst_107 = arith.constant dense<0.000000e+00> : vector<64x4xf32>
    %365 = tpu.matmul %363, %364, %cst_107 {dimension_numbers = #tpu.dot_dimension_numbers<[1], [0], [0], [1], [0, 0, 1, 1], [], []>} : vector<64x32xf32>, vector<32x4xf32>, vector<64x4xf32> -> vector<64x4xf32>
    %c0_108 = arith.constant 0 : index
    %c0_109 = arith.constant 0 : index
    %366 = vector.load %arg8[%c0_108, %c0_109] : memref<1x4xf32, #tpu.memory_space<vmem>>, vector<1x4xf32>
    %367 = vector.broadcast %366 : vector<1x4xf32> to vector<64x4xf32>
    %368 = arith.addf %365, %367 : vector<64x4xf32>
    %c0_110 = arith.constant 0 : index
    %c0_111 = arith.constant 0 : index
    %369 = vector.load %arg9[%c0_110, %c0_111] : memref<64x4xf32, #tpu.memory_space<vmem>>, vector<64x4xf32>
    tpu.vector_store %arg9[%c0_110, %c0_111], %368 {strides = array<i32>} : memref<64x4xf32, #tpu.memory_space<vmem>>, vector<64x4xf32>,
    return
  }
  func.func @transform_0(%arg0: i32) -> (i32, i32) {
    %c0_i32 = arith.constant 0 : i32
    %c0_i32_0 = arith.constant 0 : i32
    %c0_i32_1 = arith.constant 0 : i32
    return %c0_i32, %c0_i32_0 : i32, i32
  }
  func.func @transform_1(%arg0: i32) -> (i32, i32) {
    %c0_i32 = arith.constant 0 : i32
    %c0_i32_0 = arith.constant 0 : i32
    %c0_i32_1 = arith.constant 0 : i32
    return %c0_i32, %c0_i32_0 : i32, i32
  }
  func.func @transform_2(%arg0: i32) -> (i32, i32) {
    %c0_i32 = arith.constant 0 : i32
    %c0_i32_0 = arith.constant 0 : i32
    %c0_i32_1 = arith.constant 0 : i32
    return %c0_i32, %c0_i32_0 : i32, i32
  }
  func.func @transform_3(%arg0: i32) -> (i32, i32) {
    %c0_i32 = arith.constant 0 : i32
    %c0_i32_0 = arith.constant 0 : i32
    %c0_i32_1 = arith.constant 0 : i32
    return %c0_i32, %c0_i32_0 : i32, i32
  }
  func.func @transform_4(%arg0: i32) -> (i32, i32) {
    %c0_i32 = arith.constant 0 : i32
    %c0_i32_0 = arith.constant 0 : i32
    %c0_i32_1 = arith.constant 0 : i32
    return %c0_i32, %c0_i32_0 : i32, i32
  }
  func.func @transform_5(%arg0: i32) -> (i32, i32) {
    %c0_i32 = arith.constant 0 : i32
    %c0_i32_0 = arith.constant 0 : i32
    %c0_i32_1 = arith.constant 0 : i32
    return %c0_i32, %c0_i32_0 : i32, i32
  }
  func.func @transform_6(%arg0: i32) -> (i32, i32) {
    %c0_i32 = arith.constant 0 : i32
    %c0_i32_0 = arith.constant 0 : i32
    %c0_i32_1 = arith.constant 0 : i32
    return %c0_i32, %c0_i32_0 : i32, i32
  }
  func.func @transform_7(%arg0: i32) -> (i32, i32) {
    %c0_i32 = arith.constant 0 : i32
    %c0_i32_0 = arith.constant 0 : i32
    %c0_i32_1 = arith.constant 0 : i32
    return %c0_i32, %c0_i32_0 : i32, i32
  }
  func.func @transform_8(%arg0: i32) -> (i32, i32) {
    %c0_i32 = arith.constant 0 : i32
    %c0_i32_0 = arith.constant 0 : i32
    %c0_i32_1 = arith.constant 0 : i32
    return %c0_i32, %c0_i32_0 : i32, i32
  }
}

</mosaic_0001>

<bundles_post_ra>
// kernel: lstm_model_forward.1
= control target key start
LH: loop header
LB: loop body
LE: loop exit
PB: predicated region body
PF: predicated region fallthrough
CT: control target
= control target key end

     0   :  { %13 = vsyncpa [#allocation5], 0  ;;  %s3435_s0 = inlined_call_operand.hbm [shape: f32[64,16], index: 0, kind: input, shape index: {}]   ;;  %s3436_s1 = inlined_call_operand.hbm [shape: f32[16,128], index: 1, kind: input, shape index: {}]   ;;  %s3437_s2 = inlined_call_operand.vmem [shape: f32[32,128], index: 2, kind: input, shape index: {}]   ;;  %s3438_s3 = inlined_call_operand.vmem [shape: f32[1,128], index: 3, kind: input, shape index: {}]   ;;  %s3439_s4 = inlined_call_operand.hbm [shape: f32[64,128], index: 4, kind: input, shape index: {}]   ;;  %s3440_s5 = inlined_call_operand.vmem [shape: f32[1,128], index: 5, kind: input, shape index: {}]   ;;  %s3441_s6 = inlined_call_operand.vmem [shape: f32[32,4], index: 6, kind: input, shape index: {}]   ;;  %s3442_s7 = inlined_call_operand.vmem [shape: f32[1,4], index: 7, kind: input, shape index: {}]   ;;  %s3443_s8 = inlined_call_operand.vmem [shape: f32[64,4], index: 8, kind: output, shape index: {}]  }
   0x1   :  { %14 = vsyncpa [#allocation7], 0  ;;  %s2895_s27 = smov [#allocation6]   ;;  %s2896_s29 = smov [#allocation4]  }
   0x2   :  { %s32_s28 = sshll.u32 %s2895_s27, 4  ;;  %s20_s30 = sshll.u32 %s2896_s29, 4  ;;  %s33_s28 = int_to_ptr.vmem [resolvable:$true] %s32_s28  ;;  %s2950_s30 = int_to_ptr.vmem [resolvable:$true] %s20_s30 }
   0x3   :  { %s2825_s11 = scalar_lea.hbm %s3436_s1, 256 }
   0x4   :  { %p2826_p0 = scmp.ne.s32.totalorder %s3436_s1, %s2825_s11  ;;  %p2829_p1 = scmp.lt.u32.totalorder %s2825_s11, %s3436_s1 }
   0x6   :  { %p2831_p2 = pnand %p2829_p1, %p2826_p0 }
   0x8   :  { %2834 = shalt.err (!%p2831_p2)
}
   0x9   :  { %s2835_s16 = scalar_lea.vmem %s33_s28, 256  ;;  %p2840_p4 = scmp.lt.s32.totalorder %s33_s28, %s33_s28 }
   0xa   :  { %p2836_p3 = scmp.ne.s32.totalorder %s33_s28, %s2835_s16  ;;  %p2841_p5 = scmp.lt.s32.totalorder %s2835_s16, %s2835_s16 }
   0xc   :  { %p2842_p6 = por %p2841_p5, %p2840_p4 }
   0xe   :  { %p2843_p7 = pnand %p2842_p6, %p2836_p3 }
  0x10   :  { %2846 = shalt.err (!%p2843_p7)
}
  0x11   :  { %s2897_s17 = smov 128   ;;  %s2898_s18 = smov 8  }
  0x12   :  { %38 = dma.hbm_to_vmem [thread:$0]  %s3436_s1, 256, %s33_s28, [#allocation7], %s2897_s17, %s2897_s17, %s2898_s18  }
  0x13   :  { %s2847_s23 = scalar_lea.hbm %s3435_s0, 1024 }
  0x14   :  { %p2848_p8 = scmp.ne.s32.totalorder %s3435_s0, %s2847_s23  ;;  %p2851_p9 = scmp.lt.u32.totalorder %s2847_s23, %s3435_s0 }
  0x16   :  { %p2853_p10 = pnand %p2851_p9, %p2848_p8 }
  0x18   :  { %2856 = shalt.err (!%p2853_p10)
}
  0x19   :  { %s2857_s29 = scalar_lea.vmem %s2950_s30, 1024  ;;  %p2862_p12 = scmp.lt.s32.totalorder %s2950_s30, %s2950_s30 }
  0x1a   :  { %p2858_p11 = scmp.ne.s32.totalorder %s2950_s30, %s2857_s29  ;;  %p2863_p13 = scmp.lt.s32.totalorder %s2857_s29, %s2857_s29 }
  0x1c   :  { %p2864_p0 = por %p2863_p13, %p2862_p12 }
  0x1e   :  { %p2865_p1 = pnand %p2864_p0, %p2858_p11 }
  0x20   :  { %2868 = shalt.err (!%p2865_p1)
}
  0x21   :  { %26 = dma.hbm_to_vmem [thread:$0]  %s3435_s0, 1024, %s2950_s30, [#allocation5], %s2897_s17, %s2897_s17, %s2898_s18  }
  0x22   :  { %s2899_s9 = smov [#allocation8]   ;;  %s2869_s13 = scalar_lea.hbm %s3439_s4, 1024 }
  0x23   :  { %s48_s10 = sshll.u32 %s2899_s9, 4  ;;  %p2870_p2 = scmp.ne.s32.totalorder %s3439_s4, %s2869_s13  ;;  %s49_s10 = int_to_ptr.vmem [resolvable:$true] %s48_s10 }
  0x24   :  { %p2873_p3 = scmp.lt.u32.totalorder %s2869_s13, %s3439_s4 }
  0x26   :  { %p2875_p4 = pnand %p2873_p3, %p2870_p2 }
  0x28   :  { %2878 = shalt.err (!%p2875_p4)
}
  0x29   :  { %s2879_s20 = scalar_lea.vmem %s49_s10, 1024  ;;  %p2884_p6 = scmp.lt.s32.totalorder %s49_s10, %s49_s10 }
  0x2a   :  { %p2880_p5 = scmp.ne.s32.totalorder %s49_s10, %s2879_s20  ;;  %p2885_p7 = scmp.lt.s32.totalorder %s2879_s20, %s2879_s20 }
  0x2c   :  { %p2886_p8 = por %p2885_p7, %p2884_p6 }
  0x2e   :  { %p2887_p9 = pnand %p2886_p8, %p2880_p5 }
  0x30   :  { %2890 = shalt.err (!%p2887_p9)
}
  0x31   :  { %54 = dma.hbm_to_vmem [thread:$0]  %s3439_s4, 1024, %s49_s10, [#allocation7], %s2897_s17, %s2897_s17, %s2898_s18  }
  0x32   :  { %2891 = dma.done.wait [#allocation5], 1024  }
  0x33   :  { %2892 = vsyncadd [#allocation5], 4294966272 }
  0x34   :  { %2893 = dma.done.wait [#allocation7], 1280  }
  0x35   :  { %2894 = vsyncadd [#allocation7], 4294966016  ;;  %v2900_v0 = vmov 0.0|0.0   ;;  %vm2901_vm0 = vmmov 0   ;;  %v2902_v1 = vmov 0.0   ;;  %vm87_vm1 = vcmask 130048  }
  0x36   :  { %2567 = vmatprep.subr.bf16.mxu1 %v2900_v0  ;;  %2311 = vmatprep.mubr.msk.f32.mxu1 %vm2901_vm0, %v2902_v1  ;;  %v78_v2 = vld [vmem:[#allocation6] sm:$0xff]  ;;  %v79_v3 = vld [vmem:[#allocation6 + $0x8] sm:$0xff]  ;;  %v227_v9 = vld [vmem:[%s3437_s2 + $0x10] sm:$0xff]  ;;  %s2903_s27 = smov 64   ;;  %vm239_vm2 = vcmask 261120   ;;  %vm350_vm3 = vcmask 523264  }
  0x37   :  { %v225_v4 = vld [vmem:[%s3437_s2] sm:$0xff]  ;;  %v2563_v5 = vpack.c.bf16 %v79_v3, %v78_v2  ;;  %v226_v6 = vld [vmem:[%s3437_s2 + $0x8] sm:$0xff]  ;;  %v228_v10 = vld [vmem:[%s3437_s2 + $0x18] sm:$0xff]  ;;  %vm2072_vm4 = vcmask 31744  }
  0x38   :  { %v70_v7 = vld [vmem:[#allocation4] sm:$0xff]  ;;  %v3011_v8 = vpack.c.bf16 %v226_v6, %v225_v4  ;;  %v71_v11 = vld [vmem:[#allocation4 + $0x8] sm:$0xff]  ;;  %v3021_v12 = vpack.c.bf16 %v228_v10, %v227_v9  ;;  %v229_v31 = vld [vmem:[#allocation8] sm:$0xff] }
  0x39   :  { %2291 = vmatprep.mubr.msk.f32.mxu0 %vm87_vm1, %v70_v7  ;;  %2564 = vmatprep.subr.bf16.mxu0 %v2563_v5  ;;  %v3038_v13 = vld [vmem:[%s3438_s3] ss:$0 sm:$0xff]  ;;  %s2904_s3 = smov 32   ;;  %v230_v32 = vld [vmem:[#allocation8 + $0x8] sm:$0xff]  ;;  %v72_v33 = vld [vmem:[#allocation4 + $0x10] sm:$0xff] }
  0x3a   :  { %2569 = vmatpush3.bf16.msra.mxu1 %v3011_v8  ;;  %2566 = vmatpush3.bf16.msra.mxu0 %v2563_v5  ;;  %v3048_v34 = vpack.c.bf16 %v230_v32, %v229_v31  ;;  %v73_v35 = vld [vmem:[#allocation4 + $0x18] sm:$0xff]  ;;  %v231_v36 = vld [vmem:[#allocation8 + $0x10] sm:$0xff]  ;;  %v232_v37 = vld [vmem:[#allocation8 + $0x18] sm:$0xff] }
  0x3b   :  { %2570 = vmatprep.subr.bf16.mxu1 %v2900_v0  ;;  %2573 = vmatprep.subr.bf16.mxu0 %v2900_v0  ;;  %v74_v38 = vld [vmem:[#allocation4 + $0x20] sm:$0xff]  ;;  %v3053_v39 = vpack.c.bf16 %v232_v37, %v231_v36  ;;  %v75_v40 = vld [vmem:[#allocation4 + $0x28] sm:$0xff]  ;;  %v233_v41 = vld [vmem:[#allocation8 + $0x20] sm:$0xff] }
  0x3c   :  { %v234_v42 = vld [vmem:[#allocation8 + $0x28] sm:$0xff]  ;;  %v76_v43 = vld [vmem:[#allocation4 + $0x30] sm:$0xff]  ;;  %v235_v46 = vld [vmem:[#allocation8 + $0x30] sm:$0xff] }
  0x3d   :  { %2292 = vmatmul.mubr.msk.f32.vlgmr.msra.gmra.mrb[0].mxu0 %vm87_vm1, %v71_v11  ;;  %v3059_v44 = vpack.c.bf16 %v234_v42, %v233_v41  ;;  %v77_v45 = vld [vmem:[#allocation4 + $0x38] sm:$0xff]  ;;  %v236_v47 = vld [vmem:[#allocation8 + $0x38] sm:$0xff]  ;;  %v3110_v61 = vld [vmem:[%s3440_s5] ss:$0 sm:$0xff] }
  0x3e   :  { %2572 = vmatpush3.bf16.msra.mxu1 %v3021_v12  ;;  %2294 = vmatprep.mubr.msk.f32.mxu0 %vm87_vm1, %v72_v33  ;;  %v3066_v49 = vpack.c.bf16 %v236_v47, %v235_v46 }
  0x3f   :  { %2585 = vmatprep.subr.bf16.mxu1 %v2900_v0  ;;  %2575 = vmatpush3.bf16.msra.mxu0 %v3048_v34 }
  0x40   :  { %2576 = vmatprep.subr.bf16.mxu0 %v2900_v0 }
  0x41   :  { %2312 = vmatmul.mubr.f32.vlgmr.msra.gmra.mrb[0].mxu1 %v2902_v1  ;;  %2295 = vmatmul.mubr.msk.f32.gmra.mrb[2].mxu0 %vm87_vm1, %v73_v35 }
  0x42   :  { %2587 = vmatpush3.bf16.msra.mxu1 %v3011_v8  ;;  %2341 = vmatprep.mubr.msk.f32.mxu1 %vm2901_vm0, %v2902_v1 }
  0x43   :  { %2588 = vmatprep.subr.bf16.mxu1 %v2900_v0  ;;  %2297 = vmatprep.mubr.msk.f32.mxu0 %vm87_vm1, %v74_v38 }
  0x44   :  { %2578 = vmatpush3.bf16.msra.mxu0 %v3053_v39 }
  0x45   :  { %2298 = vmatmul.mubr.msk.f32.gmra.mrb[4].mxu0 %vm87_vm1, %v75_v40  ;;  %2579 = vmatprep.subr.bf16.mxu0 %v2900_v0 }
  0x46   :  { %2590 = vmatpush3.bf16.msra.mxu1 %v3021_v12  ;;  %2300 = vmatprep.mubr.msk.f32.mxu0 %vm87_vm1, %v76_v43 }
  0x47   :  { %2591 = vmatprep.subr.bf16.mxu1 %v2900_v0 }
  0x48   :  { %2581 = vmatpush3.bf16.msra.mxu0 %v3059_v44 }
  0x49   :  { %2301 = vmatmul.mubr.msk.f32.gmra.mrb[6].mxu0 %vm87_vm1, %v77_v45  ;;  %2582 = vmatprep.subr.bf16.mxu0 %v2900_v0 }
  0x4a   :  { %2330 = vmatprep.mubr.msk.f32.mxu0 %vm2901_vm0, %v2902_v1 }
  0x4c   :  { %2584 = vmatpush3.bf16.msra.mxu0 %v3066_v49 }
  0x4d   :  { %2603 = vmatprep.subr.bf16.mxu0 %v2900_v0 }
 0x110   :  { %v3040_v14 = vpop.f32.mrb[0].mxu0 }
 0x111   :  { %v178_v15 = vpop.f32.mrb[1].mxu0  ;;  %v184_v60 = vadd.f32 %v3040_v14, %v3038_v13 }
 0x112   :  { %v179_v16 = vadd.f32 %v3038_v13, %v178_v15 }
 0x114   :  { %v309_v17 = vpop.f32.mrb[0].mxu1  ;;  %v3074_v52 = vpop.f32.mrb[2].mxu0 }
 0x115   :  { %v313_v18 = vadd.f32 %v309_v17, %v179_v16  ;;  %v2313_v19 = vpop.f32.mrb[1].mxu1  ;;  %v3076_v53 = vpop.f32.mrb[3].mxu0 }
 0x116   :  { %v189_v42 = vadd.f32 %v3038_v13, %v3076_v53 }
 0x117   :  { %v2096_v20 = vmul.f32 -1.442695, %v313_v18 }
 0x118   :  { %v3078_v54 = vpop.f32.mrb[4].mxu0 }
 0x119   :  { %2729 = vpow2.f32 %v2096_v20  ;;  %v3080_v55 = vpop.f32.mrb[5].mxu0 }
 0x11c   :  { %v3082_v56 = vpop.f32.mrb[6].mxu0 }
 0x11d   :  { %v3084_v57 = vpop.f32.mrb[7].mxu0 }
 0x123   :  { %v2730_v21 = vpop.eup %2729 }
 0x124   :  { %v317_v22 = vadd.f32 1.0, %v2730_v21 }
 0x126   :  { %2731 = vrcp.f32 %v317_v22 }
 0x130   :  { %v2732_v23 = vpop.eup %2731 }
 0x131   :  { %v320_v24 = vmul.f32 2.0, %v2732_v23  ;;  %v322_v28 = vmul.f32 0.0, %v2732_v23 }
 0x133   :  { %v2097_v25 = vadd.f32 -1.0, %v320_v24 }
 0x135   :  { %324 = vrot.lane.b32.xlu0 %v2097_v25, %s2903_s27 }
 0x1a7   :  { %v325_v26 = vpop.permute.xlu0 %324 }
 0x1a8   :  { %v327_v27 = vmul.f32 %v2732_v23, %v325_v26 }
 0x1aa   :  { %329 = vrot.lane.b32.xlu0 %v327_v27, %s2904_s3 }
 0x21c   :  { %v330_v29 = vpop.permute.xlu0 %329 }
 0x21d   :  { %v3045_v30 = vadd.f32 %v330_v29, %v322_v28 }
 0x21f   :  { %2733 = vtanh.f32 %v3045_v30 }
 0x229   :  { %v2734_v48 = vpop.eup %2733 }
 0x22a   :  { %335 = vrot.lane.b32.xlu1 %v2734_v48, %s2903_s27 }
 0x29c   :  { %v336_v50 = vpop.permute.xlu1 %335 }
 0x29d   :  { %v338_v51 = vmul.f32 %v2732_v23, %v336_v50 }
 0x29f   :  { %340 = vrot.lane.b32.xlu1 %v338_v51, %s2904_s3 }
 0x311   :  { %v341_v58 = vpop.permute.xlu1 %340 }
 0x312   :  { %v343_v59 = vsel %vm239_vm2, %v341_v58, 0.0  ;;  %2342 = vmatmul.mubr.msk.f32.vlgmr.msra.gmra.mrb[2].mxu1 %vm239_vm2, %v341_v58 }
 0x313   :  { %2331 = vmatmul.mubr.msk.f32.vlgmr.msra.gmra.mrb[8].mxu0 %vm350_vm3, %v343_v59  ;;  %2593 = vmatpush3.bf16.msra.mxu1 %v3048_v34 }
 0x314   :  { %2594 = vmatprep.subr.bf16.mxu1 %v2900_v0  ;;  %2605 = vmatpush3.bf16.msra.mxu0 %v3011_v8 }
 0x315   :  { %2606 = vmatprep.subr.bf16.mxu0 %v2900_v0  ;;  %2371 = vmatprep.mubr.msk.f32.mxu0 %vm2901_vm0, %v2902_v1 }
 0x316   :  { %2360 = vmatprep.mubr.msk.f32.mxu1 %vm2901_vm0, %v2902_v1 }
 0x317   :  { %2596 = vmatpush3.bf16.msra.mxu1 %v3053_v39 }
 0x318   :  { %2597 = vmatprep.subr.bf16.mxu1 %v2900_v0  ;;  %2608 = vmatpush3.bf16.msra.mxu0 %v3021_v12 }
 0x319   :  { %2609 = vmatprep.subr.bf16.mxu0 %v2900_v0 }
 0x31b   :  { %2599 = vmatpush3.bf16.msra.mxu1 %v3059_v44 }
 0x31c   :  { %2600 = vmatprep.subr.bf16.mxu1 %v2900_v0 }
 0x31f   :  { %2602 = vmatpush3.bf16.msra.mxu1 %v3066_v49 }
 0x320   :  { %2621 = vmatprep.subr.bf16.mxu1 %v2900_v0 }
 0x3e5   :  { %v523_v62 = vpop.f32.mrb[2].mxu1 }
 0x3e6   :  { %v527_v63 = vadd.f32 %v523_v62, %v184_v60  ;;  %v420_v2 = vpop.f32.mrb[8].mxu0  ;;  %v2343_v3 = vpop.f32.mrb[3].mxu1 }
 0x3e7   :  { %v421_v4 = vadd.f32 %v3110_v61, %v420_v2  ;;  %v2332_v5 = vpop.f32.mrb[9].mxu0 }
 0x3e8   :  { %v2103_v6 = vmul.f32 -1.442695, %v527_v63 }
 0x3e9   :  { %v2100_v7 = vmul.f32 -1.442695, %v421_v4 }
 0x3ea   :  { %2735 = vpow2.f32 %v2103_v6 }
 0x3eb   :  { %2737 = vpow2.f32 %v2100_v7 }
 0x3f4   :  { %v2736_v9 = vpop.eup %2735 }
 0x3f5   :  { %v2738_v10 = vpop.eup %2737  ;;  %v531_v11 = vadd.f32 1.0, %v2736_v9 }
 0x3f6   :  { %v427_v14 = vadd.f32 1.0, %v2738_v10 }
 0x3f7   :  { %2739 = vrcp.f32 %v531_v11 }
 0x3f8   :  { %2741 = vrcp.f32 %v427_v14 }
 0x401   :  { %v2740_v15 = vpop.eup %2739 }
 0x402   :  { %v2742_v16 = vpop.eup %2741  ;;  %v534_v17 = vmul.f32 2.0, %v2740_v15  ;;  %v536_v25 = vmul.f32 %v2740_v15, %v3045_v30 }
 0x403   :  { %v430_v18 = vmul.f32 2.0, %v2742_v16  ;;  %v432_v27 = vmul.f32 0.0, %v2742_v16 }
 0x404   :  { %v2104_v19 = vadd.f32 -1.0, %v534_v17 }
 0x405   :  { %v2101_v20 = vadd.f32 -1.0, %v430_v18 }
 0x406   :  { %538 = vrot.lane.b32.xlu1 %v2104_v19, %s2903_s27 }
 0x407   :  { %434 = vrot.lane.b32.xlu0 %v2101_v20, %s2903_s27 }
 0x478   :  { %v539_v21 = vpop.permute.xlu1 %538 }
 0x479   :  { %v541_v22 = vmul.f32 %v2740_v15, %v539_v21  ;;  %v435_v23 = vpop.permute.xlu0 %434 }
 0x47a   :  { %v437_v24 = vmul.f32 %v2742_v16, %v435_v23 }
 0x47b   :  { %543 = vrot.lane.b32.xlu1 %v541_v22, %s2904_s3 }
 0x47c   :  { %439 = vrot.lane.b32.xlu0 %v437_v24, %s2904_s3 }
 0x4ed   :  { %v544_v26 = vpop.permute.xlu1 %543 }
 0x4ee   :  { %v3118_v28 = vadd.f32 %v544_v26, %v536_v25  ;;  %v440_v29 = vpop.permute.xlu0 %439 }
 0x4ef   :  { %v3120_v31 = vadd.f32 %v440_v29, %v432_v27  ;;  %v194_v29 = vadd.f32 %v3074_v52, %v3038_v13 }
 0x4f0   :  { %2743 = vtanh.f32 %v3118_v28 }
 0x4f1   :  { %2745 = vtanh.f32 %v3120_v31 }
 0x4fa   :  { %v2744_v32 = vpop.eup %2743 }
 0x4fb   :  { %v2746_v33 = vpop.eup %2745  ;;  %549 = vrot.lane.b32.xlu1 %v2744_v32, %s2903_s27 }
 0x4fc   :  { %445 = vrot.lane.b32.xlu0 %v2746_v33, %s2903_s27 }
 0x56d   :  { %v550_v35 = vpop.permute.xlu1 %549 }
 0x56e   :  { %v552_v36 = vmul.f32 %v2740_v15, %v550_v35  ;;  %v446_v30 = vpop.permute.xlu0 %445 }
 0x56f   :  { %v3126_v37 = vmul.f32 %v2742_v16, %v446_v30 }
 0x570   :  { %554 = vrot.lane.b32.xlu0 %v552_v36, %s2904_s3 }
 0x571   :  { %557 = vrot.lane.b32.xlu1 %v3126_v37, %s2903_s27 }
 0x5e2   :  { %v555_v38 = vpop.permute.xlu0 %554 }
 0x5e3   :  { %v558_v40 = vpop.permute.xlu1 %557  ;;  %2372 = vmatmul.mubr.msk.f32.vlgmr.msra.gmra.mrb[10].mxu0 %vm239_vm2, %v555_v38 }
 0x5e4   :  { %v560_v41 = vsel %vm239_vm2, %v555_v38, %v558_v40  ;;  %2611 = vmatpush3.bf16.msra.mxu0 %v3048_v34  ;;  %2390 = vmatprep.mubr.msk.f32.mxu0 %vm2901_vm0, %v2902_v1 }
 0x5e5   :  { %2361 = vmatmul.mubr.msk.f32.vlgmr.msra.gmra.mrb[4].mxu1 %vm350_vm3, %v560_v41  ;;  %2612 = vmatprep.subr.bf16.mxu0 %v2900_v0 }
 0x5e6   :  { %2623 = vmatpush3.bf16.msra.mxu1 %v3011_v8  ;;  %2401 = vmatprep.mubr.msk.f32.mxu1 %vm2901_vm0, %v2902_v1 }
 0x5e7   :  { %2624 = vmatprep.subr.bf16.mxu1 %v2900_v0 }
 0x5e8   :  { %2614 = vmatpush3.bf16.msra.mxu0 %v3053_v39 }
 0x5e9   :  { %2615 = vmatprep.subr.bf16.mxu0 %v2900_v0 }
 0x5ea   :  { %2626 = vmatpush3.bf16.msra.mxu1 %v3021_v12 }
 0x5eb   :  { %2627 = vmatprep.subr.bf16.mxu1 %v2900_v0 }
 0x5ec   :  { %2617 = vmatpush3.bf16.msra.mxu0 %v3059_v44 }
 0x5ed   :  { %2618 = vmatprep.subr.bf16.mxu0 %v2900_v0 }
 0x5f0   :  { %2620 = vmatpush3.bf16.msra.mxu0 %v3066_v49 }
 0x5f1   :  { %2639 = vmatprep.subr.bf16.mxu0 %v2900_v0 }
 0x6b6   :  { %v733_v43 = vpop.f32.mrb[10].mxu0 }
 0x6b7   :  { %v737_v45 = vadd.f32 %v733_v43, %v189_v42  ;;  %v2373_v46 = vpop.f32.mrb[11].mxu0 }
 0x6b8   :  { %v630_v47 = vpop.f32.mrb[4].mxu1 }
 0x6b9   :  { %v2109_v48 = vmul.f32 -1.442695, %v737_v45  ;;  %v631_v50 = vadd.f32 %v3110_v61, %v630_v47  ;;  %v2362_v51 = vpop.f32.mrb[5].mxu1 }
 0x6bb   :  { %2747 = vpow2.f32 %v2109_v48  ;;  %v2106_v58 = vmul.f32 -1.442695, %v631_v50 }
 0x6bd   :  { %2749 = vpow2.f32 %v2106_v58 }
 0x6c5   :  { %v2748_v59 = vpop.eup %2747 }
 0x6c6   :  { %v741_v60 = vadd.f32 1.0, %v2748_v59 }
 0x6c7   :  { %v2750_v62 = vpop.eup %2749 }
 0x6c8   :  { %2751 = vrcp.f32 %v741_v60  ;;  %v637_v63 = vadd.f32 1.0, %v2750_v62 }
 0x6ca   :  { %2753 = vrcp.f32 %v637_v63 }
 0x6d2   :  { %v2752_v2 = vpop.eup %2751 }
 0x6d3   :  { %v744_v3 = vmul.f32 2.0, %v2752_v2  ;;  %v746_v14 = vmul.f32 %v2752_v2, %v3118_v28 }
 0x6d4   :  { %v2754_v53 = vpop.eup %2753 }
 0x6d5   :  { %v2110_v4 = vadd.f32 -1.0, %v744_v3  ;;  %v640_v5 = vmul.f32 2.0, %v2754_v53  ;;  %v642_v17 = vmul.f32 %v2754_v53, %v3120_v31 }
 0x6d7   :  { %748 = vrot.lane.b32.xlu1 %v2110_v4, %s2903_s27  ;;  %v2107_v6 = vadd.f32 -1.0, %v640_v5 }
 0x6d9   :  { %644 = vrot.lane.b32.xlu0 %v2107_v6, %s2903_s27 }
 0x749   :  { %v749_v7 = vpop.permute.xlu1 %748 }
 0x74a   :  { %v751_v9 = vmul.f32 %v2752_v2, %v749_v7 }
 0x74b   :  { %v645_v10 = vpop.permute.xlu0 %644 }
 0x74c   :  { %v647_v11 = vmul.f32 %v2754_v53, %v645_v10  ;;  %753 = vrot.lane.b32.xlu1 %v751_v9, %s2904_s3 }
 0x74e   :  { %649 = vrot.lane.b32.xlu0 %v647_v11, %s2904_s3 }
 0x7be   :  { %v754_v15 = vpop.permute.xlu1 %753 }
 0x7bf   :  { %v3158_v16 = vadd.f32 %v754_v15, %v746_v14 }
 0x7c0   :  { %v650_v18 = vpop.permute.xlu0 %649 }
 0x7c1   :  { %2755 = vtanh.f32 %v3158_v16  ;;  %v3162_v19 = vadd.f32 %v650_v18, %v642_v17  ;;  %v199_v18 = vadd.f32 %v3038_v13, %v3080_v55 }
 0x7c3   :  { %2757 = vtanh.f32 %v3162_v19 }
 0x7cb   :  { %v2756_v20 = vpop.eup %2755 }
 0x7cc   :  { %759 = vrot.lane.b32.xlu1 %v2756_v20, %s2903_s27 }
 0x7cd   :  { %v2758_v21 = vpop.eup %2757 }
 0x7ce   :  { %655 = vrot.lane.b32.xlu0 %v2758_v21, %s2903_s27 }
 0x83e   :  { %v760_v22 = vpop.permute.xlu1 %759 }
 0x83f   :  { %v762_v23 = vmul.f32 %v2752_v2, %v760_v22 }
 0x840   :  { %v656_v24 = vpop.permute.xlu0 %655 }
 0x841   :  { %v3167_v25 = vmul.f32 %v2754_v53, %v656_v24  ;;  %764 = vrot.lane.b32.xlu0 %v762_v23, %s2904_s3 }
 0x843   :  { %767 = vrot.lane.b32.xlu1 %v3167_v25, %s2903_s27 }
 0x8b3   :  { %v765_v26 = vpop.permute.xlu0 %764 }
 0x8b4   :  { %2402 = vmatmul.mubr.msk.f32.vlgmr.msra.gmra.mrb[6].mxu1 %vm239_vm2, %v765_v26 }
 0x8b5   :  { %v768_v27 = vpop.permute.xlu1 %767  ;;  %2629 = vmatpush3.bf16.msra.mxu1 %v3048_v34  ;;  %2420 = vmatprep.mubr.msk.f32.mxu1 %vm2901_vm0, %v2902_v1 }
 0x8b6   :  { %v770_v28 = vsel %vm239_vm2, %v765_v26, %v768_v27  ;;  %2630 = vmatprep.subr.bf16.mxu1 %v2900_v0 }
 0x8b7   :  { %2391 = vmatmul.mubr.msk.f32.vlgmr.msra.gmra.mrb[12].mxu0 %vm350_vm3, %v770_v28 }
 0x8b8   :  { %2641 = vmatpush3.bf16.msra.mxu0 %v3011_v8  ;;  %2431 = vmatprep.mubr.msk.f32.mxu0 %vm2901_vm0, %v2902_v1 }
 0x8b9   :  { %2632 = vmatpush3.bf16.msra.mxu1 %v3053_v39  ;;  %2642 = vmatprep.subr.bf16.mxu0 %v2900_v0 }
 0x8ba   :  { %2633 = vmatprep.subr.bf16.mxu1 %v2900_v0 }
 0x8bc   :  { %2644 = vmatpush3.bf16.msra.mxu0 %v3021_v12 }
 0x8bd   :  { %2635 = vmatpush3.bf16.msra.mxu1 %v3059_v44  ;;  %2645 = vmatprep.subr.bf16.mxu0 %v2900_v0 }
 0x8be   :  { %2636 = vmatprep.subr.bf16.mxu1 %v2900_v0 }
 0x8c1   :  { %2638 = vmatpush3.bf16.msra.mxu1 %v3066_v49 }
 0x8c2   :  { %2657 = vmatprep.subr.bf16.mxu1 %v2900_v0 }
 0x987   :  { %v943_v31 = vpop.f32.mrb[6].mxu1 }
 0x988   :  { %v947_v32 = vadd.f32 %v943_v31, %v194_v29  ;;  %v2403_v33 = vpop.f32.mrb[7].mxu1 }
 0x98a   :  { %v2115_v35 = vmul.f32 -1.442695, %v947_v32  ;;  %v840_v36 = vpop.f32.mrb[12].mxu0 }
 0x98b   :  { %v841_v30 = vadd.f32 %v3110_v61, %v840_v36  ;;  %v2392_v38 = vpop.f32.mrb[13].mxu0 }
 0x98c   :  { %2759 = vpow2.f32 %v2115_v35 }
 0x98d   :  { %v2112_v40 = vmul.f32 -1.442695, %v841_v30 }
 0x98f   :  { %2761 = vpow2.f32 %v2112_v40 }
 0x996   :  { %v2760_v41 = vpop.eup %2759 }
 0x997   :  { %v951_v42 = vadd.f32 1.0, %v2760_v41 }
 0x999   :  { %v2762_v43 = vpop.eup %2761  ;;  %2763 = vrcp.f32 %v951_v42 }
 0x99a   :  { %v847_v45 = vadd.f32 1.0, %v2762_v43 }
 0x99c   :  { %2765 = vrcp.f32 %v847_v45 }
 0x9a3   :  { %v2764_v46 = vpop.eup %2763 }
 0x9a4   :  { %v954_v47 = vmul.f32 2.0, %v2764_v46  ;;  %v956_v63 = vmul.f32 %v2764_v46, %v3158_v16 }
 0x9a6   :  { %v2766_v52 = vpop.eup %2765  ;;  %v2116_v48 = vadd.f32 -1.0, %v954_v47 }
 0x9a7   :  { %v850_v50 = vmul.f32 2.0, %v2766_v52  ;;  %v852_v53 = vmul.f32 %v2766_v52, %v3162_v19 }
 0x9a8   :  { %958 = vrot.lane.b32.xlu1 %v2116_v48, %s2903_s27 }
 0x9a9   :  { %v2113_v51 = vadd.f32 -1.0, %v850_v50 }
 0x9ab   :  { %854 = vrot.lane.b32.xlu0 %v2113_v51, %s2903_s27 }
 0xa1a   :  { %v959_v58 = vpop.permute.xlu1 %958 }
 0xa1b   :  { %v961_v59 = vmul.f32 %v2764_v46, %v959_v58 }
 0xa1d   :  { %963 = vrot.lane.b32.xlu1 %v961_v59, %s2904_s3  ;;  %v855_v60 = vpop.permute.xlu0 %854 }
 0xa1e   :  { %v857_v62 = vmul.f32 %v2766_v52, %v855_v60 }
 0xa20   :  { %859 = vrot.lane.b32.xlu0 %v857_v62, %s2904_s3 }
 0xa8f   :  { %v964_v2 = vpop.permute.xlu1 %963 }
 0xa90   :  { %v3199_v3 = vadd.f32 %v964_v2, %v956_v63 }
 0xa92   :  { %2767 = vtanh.f32 %v3199_v3  ;;  %v860_v4 = vpop.permute.xlu0 %859 }
 0xa93   :  { %v3203_v5 = vadd.f32 %v860_v4, %v852_v53  ;;  %v204_v4 = vadd.f32 %v3078_v54, %v3038_v13 }
 0xa95   :  { %2769 = vtanh.f32 %v3203_v5 }
 0xa9c   :  { %v2768_v6 = vpop.eup %2767 }
 0xa9d   :  { %969 = vrot.lane.b32.xlu1 %v2768_v6, %s2903_s27 }
 0xa9f   :  { %v2770_v7 = vpop.eup %2769 }
 0xaa0   :  { %865 = vrot.lane.b32.xlu0 %v2770_v7, %s2903_s27 }
 0xb0f   :  { %v970_v9 = vpop.permute.xlu1 %969 }
 0xb10   :  { %v972_v10 = vmul.f32 %v2764_v46, %v970_v9 }
 0xb12   :  { %974 = vrot.lane.b32.xlu0 %v972_v10, %s2904_s3  ;;  %v866_v11 = vpop.permute.xlu0 %865 }
 0xb13   :  { %v3209_v14 = vmul.f32 %v2766_v52, %v866_v11 }
 0xb15   :  { %977 = vrot.lane.b32.xlu1 %v3209_v14, %s2903_s27 }
 0xb84   :  { %v975_v15 = vpop.permute.xlu0 %974 }
 0xb85   :  { %2432 = vmatmul.mubr.msk.f32.vlgmr.msra.gmra.mrb[14].mxu0 %vm239_vm2, %v975_v15 }
 0xb86   :  { %2647 = vmatpush3.bf16.msra.mxu0 %v3048_v34  ;;  %2450 = vmatprep.mubr.msk.f32.mxu0 %vm2901_vm0, %v2902_v1 }
 0xb87   :  { %v978_v16 = vpop.permute.xlu1 %977  ;;  %2648 = vmatprep.subr.bf16.mxu0 %v2900_v0 }
 0xb88   :  { %v980_v17 = vsel %vm239_vm2, %v975_v15, %v978_v16 }
 0xb89   :  { %2421 = vmatmul.mubr.msk.f32.vlgmr.msra.gmra.mrb[8].mxu1 %vm350_vm3, %v980_v17 }
 0xb8a   :  { %2659 = vmatpush3.bf16.msra.mxu1 %v3011_v8  ;;  %2650 = vmatpush3.bf16.msra.mxu0 %v3053_v39 }
 0xb8b   :  { %2660 = vmatprep.subr.bf16.mxu1 %v2900_v0  ;;  %2651 = vmatprep.subr.bf16.mxu0 %v2900_v0 }
 0xb8c   :  { %2461 = vmatprep.mubr.msk.f32.mxu1 %vm2901_vm0, %v2902_v1 }
 0xb8e   :  { %2662 = vmatpush3.bf16.msra.mxu1 %v3021_v12  ;;  %2653 = vmatpush3.bf16.msra.mxu0 %v3059_v44 }
 0xb8f   :  { %2654 = vmatprep.subr.bf16.mxu0 %v2900_v0  ;;  %2663 = vmatprep.subr.bf16.mxu1 %v2900_v0 }
 0xb92   :  { %2656 = vmatpush3.bf16.msra.mxu0 %v3066_v49 }
 0xb93   :  { %2675 = vmatprep.subr.bf16.mxu0 %v2900_v0 }
 0xc58   :  { %v1153_v19 = vpop.f32.mrb[14].mxu0 }
 0xc59   :  { %v1157_v20 = vadd.f32 %v1153_v19, %v199_v18  ;;  %v2433_v21 = vpop.f32.mrb[15].mxu0 }
 0xc5b   :  { %v2121_v22 = vmul.f32 -1.442695, %v1157_v20 }
 0xc5c   :  { %v1050_v23 = vpop.f32.mrb[8].mxu1 }
 0xc5d   :  { %2771 = vpow2.f32 %v2121_v22  ;;  %v1051_v24 = vadd.f32 %v3110_v61, %v1050_v23  ;;  %v2422_v26 = vpop.f32.mrb[9].mxu1 }
 0xc5f   :  { %v2118_v27 = vmul.f32 -1.442695, %v1051_v24 }
 0xc61   :  { %2773 = vpow2.f32 %v2118_v27 }
 0xc67   :  { %v2772_v28 = vpop.eup %2771 }
 0xc68   :  { %v1161_v29 = vadd.f32 1.0, %v2772_v28 }
 0xc6a   :  { %2775 = vrcp.f32 %v1161_v29 }
 0xc6b   :  { %v2774_v31 = vpop.eup %2773 }
 0xc6c   :  { %v1057_v32 = vadd.f32 1.0, %v2774_v31 }
 0xc6e   :  { %2777 = vrcp.f32 %v1057_v32 }
 0xc74   :  { %v2776_v33 = vpop.eup %2775 }
 0xc75   :  { %v1164_v35 = vmul.f32 2.0, %v2776_v33  ;;  %v1166_v45 = vmul.f32 %v2776_v33, %v3199_v3 }
 0xc77   :  { %v2122_v55 = vadd.f32 -1.0, %v1164_v35 }
 0xc78   :  { %v2778_v36 = vpop.eup %2777 }
 0xc79   :  { %1168 = vrot.lane.b32.xlu1 %v2122_v55, %s2903_s27  ;;  %v1060_v30 = vmul.f32 2.0, %v2778_v36  ;;  %v1062_v52 = vmul.f32 %v2778_v36, %v3203_v5 }
 0xc7b   :  { %v2119_v38 = vadd.f32 -1.0, %v1060_v30 }
 0xc7d   :  { %1064 = vrot.lane.b32.xlu0 %v2119_v38, %s2903_s27 }
 0xceb   :  { %v1169_v40 = vpop.permute.xlu1 %1168 }
 0xcec   :  { %v1171_v41 = vmul.f32 %v2776_v33, %v1169_v40 }
 0xcee   :  { %1173 = vrot.lane.b32.xlu1 %v1171_v41, %s2904_s3 }
 0xcef   :  { %v1065_v42 = vpop.permute.xlu0 %1064 }
 0xcf0   :  { %v1067_v43 = vmul.f32 %v2778_v36, %v1065_v42 }
 0xcf2   :  { %1069 = vrot.lane.b32.xlu0 %v1067_v43, %s2904_s3 }
 0xd60   :  { %v1174_v46 = vpop.permute.xlu1 %1173 }
 0xd61   :  { %v3240_v47 = vadd.f32 %v1174_v46, %v1166_v45 }
 0xd63   :  { %2779 = vtanh.f32 %v3240_v47 }
 0xd64   :  { %v1070_v48 = vpop.permute.xlu0 %1069 }
 0xd65   :  { %v3244_v50 = vadd.f32 %v1070_v48, %v1062_v52  ;;  %v209_v48 = vadd.f32 %v3038_v13, %v3084_v57 }
 0xd67   :  { %2781 = vtanh.f32 %v3244_v50 }
 0xd6d   :  { %v2780_v51 = vpop.eup %2779 }
 0xd6e   :  { %1179 = vrot.lane.b32.xlu1 %v2780_v51, %s2903_s27 }
 0xd71   :  { %v2782_v58 = vpop.eup %2781 }
 0xd72   :  { %1075 = vrot.lane.b32.xlu0 %v2782_v58, %s2903_s27 }
 0xde0   :  { %v1180_v59 = vpop.permute.xlu1 %1179 }
 0xde1   :  { %v1182_v60 = vmul.f32 %v2776_v33, %v1180_v59 }
 0xde3   :  { %1184 = vrot.lane.b32.xlu0 %v1182_v60, %s2904_s3 }
 0xde4   :  { %v1076_v62 = vpop.permute.xlu0 %1075 }
 0xde5   :  { %v3250_v63 = vmul.f32 %v2778_v36, %v1076_v62 }
 0xde7   :  { %1187 = vrot.lane.b32.xlu1 %v3250_v63, %s2903_s27 }
 0xe55   :  { %v1185_v2 = vpop.permute.xlu0 %1184 }
 0xe56   :  { %2462 = vmatmul.mubr.msk.f32.vlgmr.msra.gmra.mrb[10].mxu1 %vm239_vm2, %v1185_v2 }
 0xe57   :  { %2665 = vmatpush3.bf16.msra.mxu1 %v3048_v34  ;;  %2480 = vmatprep.mubr.msk.f32.mxu1 %vm2901_vm0, %v2902_v1 }
 0xe58   :  { %2666 = vmatprep.subr.bf16.mxu1 %v2900_v0 }
 0xe59   :  { %v1188_v3 = vpop.permute.xlu1 %1187 }
 0xe5a   :  { %v1190_v53 = vsel %vm239_vm2, %v1185_v2, %v1188_v3 }
 0xe5b   :  { %2451 = vmatmul.mubr.msk.f32.vlgmr.msra.gmra.mrb[16].mxu0 %vm350_vm3, %v1190_v53  ;;  %2668 = vmatpush3.bf16.msra.mxu1 %v3053_v39 }
 0xe5c   :  { %2677 = vmatpush3.bf16.msra.mxu0 %v3011_v8  ;;  %2669 = vmatprep.subr.bf16.mxu1 %v2900_v0 }
 0xe5d   :  { %2678 = vmatprep.subr.bf16.mxu0 %v2900_v0  ;;  %2491 = vmatprep.mubr.msk.f32.mxu0 %vm2901_vm0, %v2902_v1 }
 0xe5f   :  { %2671 = vmatpush3.bf16.msra.mxu1 %v3059_v44 }
 0xe60   :  { %2680 = vmatpush3.bf16.msra.mxu0 %v3021_v12  ;;  %2672 = vmatprep.subr.bf16.mxu1 %v2900_v0 }
 0xe61   :  { %2681 = vmatprep.subr.bf16.mxu0 %v2900_v0 }
 0xe63   :  { %2674 = vmatpush3.bf16.msra.mxu1 %v3066_v49 }
 0xe64   :  { %2693 = vmatprep.subr.bf16.mxu1 %v2900_v0 }
 0xf29   :  { %v1363_v5 = vpop.f32.mrb[10].mxu1 }
 0xf2a   :  { %v1367_v6 = vadd.f32 %v1363_v5, %v204_v4  ;;  %v2463_v7 = vpop.f32.mrb[11].mxu1 }
 0xf2c   :  { %v2127_v9 = vmul.f32 -1.442695, %v1367_v6 }
 0xf2e   :  { %2783 = vpow2.f32 %v2127_v9  ;;  %v1260_v10 = vpop.f32.mrb[16].mxu0 }
 0xf2f   :  { %v1261_v11 = vadd.f32 %v3110_v61, %v1260_v10  ;;  %v2452_v15 = vpop.f32.mrb[17].mxu0 }
 0xf31   :  { %v2124_v16 = vmul.f32 -1.442695, %v1261_v11 }
 0xf33   :  { %2785 = vpow2.f32 %v2124_v16 }
 0xf38   :  { %v2784_v17 = vpop.eup %2783 }
 0xf39   :  { %v1371_v18 = vadd.f32 1.0, %v2784_v17 }
 0xf3b   :  { %2787 = vrcp.f32 %v1371_v18 }
 0xf3d   :  { %v2786_v19 = vpop.eup %2785 }
 0xf3e   :  { %v1267_v20 = vadd.f32 1.0, %v2786_v19 }
 0xf40   :  { %2789 = vrcp.f32 %v1267_v20 }
 0xf45   :  { %v2788_v21 = vpop.eup %2787 }
 0xf46   :  { %v1374_v22 = vmul.f32 2.0, %v2788_v21  ;;  %v1376_v32 = vmul.f32 %v2788_v21, %v3240_v47 }
 0xf48   :  { %v2128_v54 = vadd.f32 -1.0, %v1374_v22 }
 0xf4a   :  { %v2790_v23 = vpop.eup %2789  ;;  %1378 = vrot.lane.b32.xlu1 %v2128_v54, %s2903_s27 }
 0xf4b   :  { %v1270_v24 = vmul.f32 2.0, %v2790_v23  ;;  %v1272_v55 = vmul.f32 %v2790_v23, %v3244_v50 }
 0xf4d   :  { %v2125_v26 = vadd.f32 -1.0, %v1270_v24 }
 0xf4f   :  { %1274 = vrot.lane.b32.xlu0 %v2125_v26, %s2903_s27 }
 0xfbc   :  { %v1379_v27 = vpop.permute.xlu1 %1378 }
 0xfbd   :  { %v1381_v28 = vmul.f32 %v2788_v21, %v1379_v27 }
 0xfbf   :  { %1383 = vrot.lane.b32.xlu1 %v1381_v28, %s2904_s3 }
 0xfc1   :  { %v1275_v29 = vpop.permute.xlu0 %1274 }
 0xfc2   :  { %v1277_v31 = vmul.f32 %v2790_v23, %v1275_v29 }
 0xfc4   :  { %1279 = vrot.lane.b32.xlu0 %v1277_v31, %s2904_s3 }
0x1031   :  { %v1384_v33 = vpop.permute.xlu1 %1383 }
0x1032   :  { %v3281_v35 = vadd.f32 %v1384_v33, %v1376_v32 }
0x1034   :  { %2791 = vtanh.f32 %v3281_v35 }
0x1036   :  { %v1280_v36 = vpop.permute.xlu0 %1279 }
0x1037   :  { %v3285_v30 = vadd.f32 %v1280_v36, %v1272_v55 }
0x1039   :  { %2793 = vtanh.f32 %v3285_v30 }
0x103e   :  { %v2792_v38 = vpop.eup %2791 }
0x103f   :  { %1389 = vrot.lane.b32.xlu1 %v2792_v38, %s2903_s27 }
0x1043   :  { %v2794_v40 = vpop.eup %2793 }
0x1044   :  { %1285 = vrot.lane.b32.xlu0 %v2794_v40, %s2903_s27 }
0x10b1   :  { %v1390_v41 = vpop.permute.xlu1 %1389 }
0x10b2   :  { %v1392_v42 = vmul.f32 %v2788_v21, %v1390_v41 }
0x10b4   :  { %1394 = vrot.lane.b32.xlu0 %v1392_v42, %s2904_s3 }
0x10b6   :  { %v1286_v43 = vpop.permute.xlu0 %1285 }
0x10b7   :  { %v3291_v45 = vmul.f32 %v2790_v23, %v1286_v43 }
0x10b9   :  { %1397 = vrot.lane.b32.xlu1 %v3291_v45, %s2903_s27 }
0x1126   :  { %v1395_v46 = vpop.permute.xlu0 %1394 }
0x1127   :  { %2492 = vmatmul.mubr.msk.f32.vlgmr.msra.gmra.mrb[18].mxu0 %vm239_vm2, %v1395_v46 }
0x1128   :  { %2683 = vmatpush3.bf16.msra.mxu0 %v3048_v34  ;;  %2510 = vmatprep.mubr.msk.f32.mxu0 %vm2901_vm0, %v2902_v1 }
0x1129   :  { %2684 = vmatprep.subr.bf16.mxu0 %v2900_v0 }
0x112b   :  { %v1398_v47 = vpop.permute.xlu1 %1397 }
0x112c   :  { %v1400_v52 = vsel %vm239_vm2, %v1395_v46, %v1398_v47  ;;  %2686 = vmatpush3.bf16.msra.mxu0 %v3053_v39 }
0x112d   :  { %2481 = vmatmul.mubr.msk.f32.vlgmr.msra.gmra.mrb[12].mxu1 %vm350_vm3, %v1400_v52  ;;  %2687 = vmatprep.subr.bf16.mxu0 %v2900_v0 }
0x112e   :  { %2695 = vmatpush3.bf16.msra.mxu1 %v3011_v8  ;;  %2521 = vmatprep.mubr.msk.f32.mxu1 %vm2901_vm0, %v2902_v1 }
0x112f   :  { %2696 = vmatprep.subr.bf16.mxu1 %v2900_v0 }
0x1130   :  { %2689 = vmatpush3.bf16.msra.mxu0 %v3059_v44 }
0x1131   :  { %2690 = vmatprep.subr.bf16.mxu0 %v2900_v0 }
0x1132   :  { %2698 = vmatpush3.bf16.msra.mxu1 %v3021_v12 }
0x1133   :  { %2699 = vmatprep.subr.bf16.mxu1 %v2900_v0 }
0x1134   :  { %2692 = vmatpush3.bf16.msra.mxu0 %v3066_v49 }
0x11fa   :  { %v1573_v50 = vpop.f32.mrb[18].mxu0 }
0x11fb   :  { %v1577_v8 = vadd.f32 %v1573_v50, %v209_v48  ;;  %v2493_v51 = vpop.f32.mrb[19].mxu0 }
0x11fd   :  { %v2133_v58 = vmul.f32 -1.442695, %v1577_v8 }
0x11ff   :  { %2795 = vpow2.f32 %v2133_v58 }
0x1200   :  { %v1470_v59 = vpop.f32.mrb[12].mxu1 }
0x1201   :  { %v1471_v60 = vadd.f32 %v3110_v61, %v1470_v59  ;;  %v2482_v62 = vpop.f32.mrb[13].mxu1 }
0x1203   :  { %v2130_v2 = vmul.f32 -1.442695, %v1471_v60 }
0x1205   :  { %2797 = vpow2.f32 %v2130_v2 }
0x1209   :  { %v2796_v3 = vpop.eup %2795 }
0x120a   :  { %v1581_v12 = vadd.f32 1.0, %v2796_v3 }
0x120c   :  { %2799 = vrcp.f32 %v1581_v12 }
0x120f   :  { %v2798_v53 = vpop.eup %2797 }
0x1210   :  { %v1477_v4 = vadd.f32 1.0, %v2798_v53 }
0x1212   :  { %2801 = vrcp.f32 %v1477_v4 }
0x1216   :  { %v2800_v5 = vpop.eup %2799 }
0x1217   :  { %v1584_v6 = vmul.f32 2.0, %v2800_v5  ;;  %v1586_v18 = vmul.f32 %v2800_v5, %v3281_v35 }
0x1219   :  { %v2134_v57 = vadd.f32 -1.0, %v1584_v6 }
0x121b   :  { %1588 = vrot.lane.b32.xlu1 %v2134_v57, %s2903_s27 }
0x121c   :  { %v2802_v7 = vpop.eup %2801 }
0x121d   :  { %v1480_v9 = vmul.f32 2.0, %v2802_v7  ;;  %v1482_v21 = vmul.f32 %v2802_v7, %v3285_v30 }
0x121f   :  { %v2131_v10 = vadd.f32 -1.0, %v1480_v9 }
0x1221   :  { %1484 = vrot.lane.b32.xlu0 %v2131_v10, %s2903_s27 }
0x128d   :  { %v1589_v11 = vpop.permute.xlu1 %1588 }
0x128e   :  { %v1591_v15 = vmul.f32 %v2800_v5, %v1589_v11 }
0x1290   :  { %1593 = vrot.lane.b32.xlu1 %v1591_v15, %s2904_s3 }
0x1293   :  { %v1485_v16 = vpop.permute.xlu0 %1484 }
0x1294   :  { %v1487_v17 = vmul.f32 %v2802_v7, %v1485_v16 }
0x1296   :  { %1489 = vrot.lane.b32.xlu0 %v1487_v17, %s2904_s3 }
0x1302   :  { %v1594_v19 = vpop.permute.xlu1 %1593 }
0x1303   :  { %v1596_v20 = vadd.f32 %v1594_v19, %v1586_v18 }
0x1305   :  { %2803 = vtanh.f32 %v1596_v20 }
0x1308   :  { %v1490_v22 = vpop.permute.xlu0 %1489 }
0x1309   :  { %v1492_v54 = vadd.f32 %v1490_v22, %v1482_v21 }
0x130b   :  { %2805 = vtanh.f32 %v1492_v54 }
0x130f   :  { %v2804_v23 = vpop.eup %2803 }
0x1310   :  { %1599 = vrot.lane.b32.xlu1 %v2804_v23, %s2903_s27 }
0x1315   :  { %v2806_v24 = vpop.eup %2805 }
0x1316   :  { %1495 = vrot.lane.b32.xlu0 %v2806_v24, %s2903_s27 }
0x1382   :  { %v1600_v26 = vpop.permute.xlu1 %1599 }
0x1383   :  { %v1602_v27 = vmul.f32 %v2800_v5, %v1600_v26  ;;  %v1932_v26 = vld [vmem:[%s3441_s6] sm:$0xff] }
0x1385   :  { %1604 = vrot.lane.b32.xlu0 %v1602_v27, %s2904_s3  ;;  %v1933_v27 = vld [vmem:[%s3441_s6 + $0x8] sm:$0xff] }
0x1388   :  { %v1496_v28 = vpop.permute.xlu0 %1495 }
0x1389   :  { %v3325_v29 = vmul.f32 %v2802_v7, %v1496_v28 }
0x138b   :  { %1607 = vrot.lane.b32.xlu1 %v3325_v29, %s2903_s27 }
0x13f7   :  { %v1605_v31 = vpop.permute.xlu0 %1604 }
0x13f8   :  { %2522 = vmatmul.mubr.msk.f32.vlgmr.msra.gmra.mrb[14].mxu1 %vm239_vm2, %v1605_v31 }
0x13f9   :  { %2701 = vmatpush3.bf16.msra.mxu1 %v3048_v34  ;;  %2540 = vmatprep.mubr.msk.f32.mxu1 %vm2901_vm0, %v2902_v1  ;;  %v214_v1 = vadd.f32 %v3082_v56, %v3038_v13 }
0x13fa   :  { %2702 = vmatprep.subr.bf16.mxu1 %v2900_v0 }
0x13fd   :  { %v1608_v32 = vpop.permute.xlu1 %1607  ;;  %2704 = vmatpush3.bf16.msra.mxu1 %v3053_v39 }
0x13fe   :  { %v1610_v33 = vsel %vm239_vm2, %v1605_v31, %v1608_v32  ;;  %2705 = vmatprep.subr.bf16.mxu1 %v2900_v0 }
0x13ff   :  { %2511 = vmatmul.mubr.msk.f32.vlgmr.msra.gmra.mrb[20].mxu0 %vm350_vm3, %v1610_v33 }
0x1401   :  { %2707 = vmatpush3.bf16.msra.mxu1 %v3059_v44 }
0x1402   :  { %2708 = vmatprep.subr.bf16.mxu1 %v2900_v0 }
0x1405   :  { %2710 = vmatpush3.bf16.msra.mxu1 %v3066_v49 }
0x14cb   :  { %v1783_v34 = vpop.f32.mrb[14].mxu1 }
0x14cc   :  { %v1787_v35 = vadd.f32 %v1783_v34, %v214_v1  ;;  %v2523_v55 = vpop.f32.mrb[15].mxu1 }
0x14ce   :  { %v2139_v36 = vmul.f32 -1.442695, %v1787_v35 }
0x14d0   :  { %2807 = vpow2.f32 %v2139_v36 }
0x14d2   :  { %v1680_v39 = vpop.f32.mrb[20].mxu0 }
0x14d3   :  { %v1681_v30 = vadd.f32 %v3110_v61, %v1680_v39  ;;  %v2512_v38 = vpop.f32.mrb[21].mxu0 }
0x14d5   :  { %v2136_v40 = vmul.f32 -1.442695, %v1681_v30 }
0x14d7   :  { %2809 = vpow2.f32 %v2136_v40 }
0x14da   :  { %v2808_v41 = vpop.eup %2807 }
0x14db   :  { %v1791_v44 = vadd.f32 1.0, %v2808_v41 }
0x14dd   :  { %2811 = vrcp.f32 %v1791_v44 }
0x14e1   :  { %v2810_v0 = vpop.eup %2809 }
0x14e2   :  { %v1687_v42 = vadd.f32 1.0, %v2810_v0 }
0x14e4   :  { %2813 = vrcp.f32 %v1687_v42 }
0x14e7   :  { %v2812_v49 = vpop.eup %2811 }
0x14e8   :  { %v1794_v43 = vmul.f32 2.0, %v2812_v49  ;;  %v1796_v51 = vmul.f32 %v2812_v49, %v1596_v20 }
0x14ea   :  { %v2140_v13 = vadd.f32 -1.0, %v1794_v43 }
0x14ec   :  { %1798 = vrot.lane.b32.xlu1 %v2140_v13, %s2903_s27 }
0x14ee   :  { %v2814_v56 = vpop.eup %2813 }
0x14ef   :  { %v1690_v46 = vmul.f32 2.0, %v2814_v56  ;;  %v1692_v60 = vmul.f32 %v2814_v56, %v1492_v54 }
0x14f1   :  { %v2137_v47 = vadd.f32 -1.0, %v1690_v46 }
0x14f3   :  { %1694 = vrot.lane.b32.xlu0 %v2137_v47, %s2903_s27 }
0x155e   :  { %v1799_v52 = vpop.permute.xlu1 %1798 }
0x155f   :  { %v1801_v48 = vmul.f32 %v2812_v49, %v1799_v52 }
0x1561   :  { %1803 = vrot.lane.b32.xlu1 %v1801_v48, %s2904_s3 }
0x1565   :  { %v1695_v50 = vpop.permute.xlu0 %1694 }
0x1566   :  { %v1697_v8 = vmul.f32 %v2814_v56, %v1695_v50 }
0x1568   :  { %1699 = vrot.lane.b32.xlu0 %v1697_v8, %s2904_s3 }
0x15d3   :  { %v1804_v58 = vpop.permute.xlu1 %1803 }
0x15d4   :  { %v1806_v59 = vadd.f32 %v1804_v58, %v1796_v51 }
0x15d6   :  { %2815 = vtanh.f32 %v1806_v59 }
0x15da   :  { %v1700_v62 = vpop.permute.xlu0 %1699 }
0x15db   :  { %v1702_v2 = vadd.f32 %v1700_v62, %v1692_v60 }
0x15dd   :  { %2817 = vtanh.f32 %v1702_v2 }
0x15e0   :  { %v2816_v3 = vpop.eup %2815 }
0x15e1   :  { %1809 = vrot.lane.b32.xlu1 %v2816_v3, %s2903_s27 }
0x15e7   :  { %v2818_v12 = vpop.eup %2817 }
0x15e8   :  { %1705 = vrot.lane.b32.xlu0 %v2818_v12, %s2903_s27 }
0x1653   :  { %v1810_v53 = vpop.permute.xlu1 %1809 }
0x1654   :  { %v1812_v4 = vmul.f32 %v2812_v49, %v1810_v53  ;;  %v2144_v49 = vld [vmem:[%s3442_s7] ss:$0 sm:$0xff] }
0x1656   :  { %1814 = vrot.lane.b32.xlu0 %v1812_v4, %s2904_s3 }
0x165a   :  { %v1706_v5 = vpop.permute.xlu0 %1705 }
0x165b   :  { %v1708_v6 = vmul.f32 %v2814_v56, %v1706_v5 }
0x165d   :  { %1817 = vrot.lane.b32.xlu1 %v1708_v6, %s2903_s27 }
0x16c8   :  { %v1815_v57 = vpop.permute.xlu0 %1814 }
0x16cf   :  { %v1818_v7 = vpop.permute.xlu1 %1817 }
0x16d0   :  { %v1820_v9 = vsel %vm239_vm2, %v1815_v57, %v1818_v7 }
0x16d1   :  { %2541 = vmatmul.mubr.msk.f32.vlgmr.msra.gmra.mrb[16].mxu1 %vm350_vm3, %v1820_v9 }
0x17a4   :  { %v1890_v10 = vpop.f32.mrb[16].mxu1 }
0x17a5   :  { %v1891_v11 = vadd.f32 %v3110_v61, %v1890_v10  ;;  %v2542_v15 = vpop.f32.mrb[17].mxu1 }
0x17a7   :  { %v2142_v16 = vmul.f32 -1.442695, %v1891_v11 }
0x17a9   :  { %2819 = vpow2.f32 %v2142_v16 }
0x17b3   :  { %v2820_v17 = vpop.eup %2819 }
0x17b4   :  { %v1897_v18 = vadd.f32 1.0, %v2820_v17 }
0x17b6   :  { %2821 = vrcp.f32 %v1897_v18 }
0x17c0   :  { %v2822_v19 = vpop.eup %2821 }
0x17c1   :  { %v1900_v20 = vmul.f32 2.0, %v2822_v19  ;;  %v1902_v61 = vmul.f32 %v2822_v19, %v1702_v2 }
0x17c3   :  { %v2143_v21 = vadd.f32 -1.0, %v1900_v20 }
0x17c5   :  { %1904 = vrot.lane.b32.xlu0 %v2143_v21, %s2903_s27 }
0x1837   :  { %v1905_v22 = vpop.permute.xlu0 %1904 }
0x1838   :  { %v1907_v54 = vmul.f32 %v2822_v19, %v1905_v22 }
0x183a   :  { %1909 = vrot.lane.b32.xlu1 %v1907_v54, %s2904_s3 }
0x183e   :  { %450 = vrot.lane.b32.xlu1 %v3126_v37, %s2904_s3  ;;  %v2711_v37 = vpack.c.bf16 %v1933_v27, %v1932_v26 }
0x1840   :  { %2712 = vmatprep.subr.bf16.mxu0 %v2711_v37 }
0x1841   :  { %2714 = vmatpush3.bf16.msra.mxu0 %v2711_v37 }
0x1842   :  { %870 = vrot.lane.b32.xlu1 %v3209_v14, %s2904_s3  ;;  %v1934_v14 = vld [vmem:[%s3441_s6 + $0x10] sm:$0xff] }
0x1846   :  { %1290 = vrot.lane.b32.xlu1 %v3291_v45, %s2904_s3  ;;  %v1935_v45 = vld [vmem:[%s3441_s6 + $0x18] sm:$0xff] }
0x1847   :  { %v2715_v31 = vpack.c.bf16 %v1935_v45, %v1934_v14 }
0x1849   :  { %2716 = vmatprep.subr.bf16.mxu0 %v2715_v31 }
0x184a   :  { %1710 = vrot.lane.b32.xlu1 %v1708_v6, %s2904_s3  ;;  %2718 = vmatpush3.bf16.msra.mxu0 %v2715_v31 }
0x18ac   :  { %v1910_v23 = vpop.permute.xlu1 %1909 }
0x18ad   :  { %v1912_v24 = vadd.f32 %v1910_v23, %v1902_v61 }
0x18af   :  { %2823 = vtanh.f32 %v1912_v24 }
0x18b0   :  { %v451_v28 = vpop.permute.xlu1 %450 }
0x18b1   :  { %453 = vst.msk [vmem:[#allocation3] sm:$0xff] %vm239_vm2, %v451_v28 }
0x18b4   :  { %v871_v32 = vpop.permute.xlu1 %870 }
0x18b5   :  { %873 = vst.msk [vmem:[#allocation3 + $0x10] sm:$0xff] %vm239_vm2, %v871_v32 }
0x18b8   :  { %v1291_v33 = vpop.permute.xlu1 %1290  ;;  %v1924_v1 = vld [vmem:[#allocation3] sm:$0xff] }
0x18b9   :  { %v2824_v34 = vpop.eup %2823  ;;  %1293 = vst.msk [vmem:[#allocation3 + $0x20] sm:$0xff] %vm239_vm2, %v1291_v33  ;;  %2551 = vmatprep.mubr.msk.f32.mxu0 %vm239_vm2, %v1924_v1 }
0x18ba   :  { %1915 = vrot.lane.b32.xlu0 %v2824_v34, %s2903_s27 }
0x18bc   :  { %v1711_v35 = vpop.permute.xlu1 %1710 }
0x18bd   :  { %1713 = vst.msk [vmem:[#allocation3 + $0x30] sm:$0xff] %vm239_vm2, %v1711_v35 }
0x18be   :  { %660 = vrot.lane.b32.xlu0 %v3167_v25, %s2904_s3  ;;  %v1926_v25 = vld [vmem:[#allocation3 + $0x10] sm:$0xff] }
0x18c2   :  { %1080 = vrot.lane.b32.xlu0 %v3250_v63, %s2904_s3 }
0x18c4   :  { %v1930_v44 = vld [vmem:[#allocation3 + $0x30] sm:$0xff] }
0x18c6   :  { %1500 = vrot.lane.b32.xlu0 %v3325_v29, %s2904_s3  ;;  %v1928_v29 = vld [vmem:[#allocation3 + $0x20] sm:$0xff] }
0x192c   :  { %v1916_v55 = vpop.permute.xlu0 %1915 }
0x192d   :  { %v1918_v36 = vmul.f32 %v2822_v19, %v1916_v55 }
0x192f   :  { %1920 = vrot.lane.b32.xlu0 %v1918_v36, %s2904_s3 }
0x1930   :  { %v661_v39 = vpop.permute.xlu0 %660 }
0x1931   :  { %663 = vst.msk [vmem:[#allocation3 + $0x8] sm:$0xff] %vm239_vm2, %v661_v39 }
0x1934   :  { %v1081_v30 = vpop.permute.xlu0 %1080 }
0x1935   :  { %1083 = vst.msk [vmem:[#allocation3 + $0x18] sm:$0xff] %vm239_vm2, %v1081_v30 }
0x1938   :  { %v1501_v38 = vpop.permute.xlu0 %1500  ;;  %v1925_v40 = vld [vmem:[#allocation3 + $0x8] sm:$0xff] }
0x1939   :  { %1503 = vst.msk [vmem:[#allocation3 + $0x28] sm:$0xff] %vm239_vm2, %v1501_v38  ;;  %2552 = vmatmul.mubr.msk.f32.vlgmr.msra.gmra.mrb[22].mxu0 %vm239_vm2, %v1925_v40 }
0x193a   :  { %2554 = vmatprep.mubr.msk.f32.mxu0 %vm239_vm2, %v1926_v25 }
0x193c   :  { %v1927_v63 = vld [vmem:[#allocation3 + $0x18] sm:$0xff] }
0x193d   :  { %2555 = vmatmul.mubr.msk.f32.gmra.mrb[24].mxu0 %vm239_vm2, %v1927_v63 }
0x193e   :  { %2557 = vmatprep.mubr.msk.f32.mxu0 %vm239_vm2, %v1928_v29 }
0x1940   :  { %v1929_v41 = vld [vmem:[#allocation3 + $0x28] sm:$0xff] }
0x1941   :  { %2558 = vmatmul.mubr.msk.f32.gmra.mrb[26].mxu0 %vm239_vm2, %v1929_v41 }
0x1942   :  { %2560 = vmatprep.mubr.msk.f32.mxu0 %vm239_vm2, %v1930_v44 }
0x19a1   :  { %v1921_v0 = vpop.permute.xlu0 %1920 }
0x19a2   :  { %1923 = vst.msk [vmem:[#allocation3 + $0x38] sm:$0xff] %vm239_vm2, %v1921_v0 }
0x19a9   :  { %v1931_v42 = vld [vmem:[#allocation3 + $0x38] sm:$0xff] }
0x19aa   :  { %2561 = vmatmul.mubr.msk.f32.gmra.mrb[28].mxu0 %vm239_vm2, %v1931_v42 }
0x1a0c   :  { %v2553_v43 = vpop.f32.mrb[22].mxu0 }
0x1a0d   :  { %v2039_v13 = vadd.f32 %v2553_v43, %v2144_v49  ;;  %v2033_v56 = vpop.f32.mrb[23].mxu0 }
0x1a0e   :  { %v2034_v46 = vadd.f32 %v2144_v49, %v2033_v56 }
0x1a0f   :  { %2074 = vst.msk [vmem:[%s3443_s8 + $0x8] sm:$0xff] %vm2072_vm4, %v2039_v13 }
0x1a10   :  { %2073 = vst.msk [vmem:[%s3443_s8] sm:$0xff] %vm2072_vm4, %v2034_v46  ;;  %v2556_v47 = vpop.f32.mrb[24].mxu0 }
0x1a11   :  { %v2049_v52 = vadd.f32 %v2556_v47, %v2144_v49  ;;  %v2043_v48 = vpop.f32.mrb[25].mxu0 }
0x1a12   :  { %v2044_v50 = vadd.f32 %v2144_v49, %v2043_v48 }
0x1a13   :  { %2076 = vst.msk [vmem:[%s3443_s8 + $0x18] sm:$0xff] %vm2072_vm4, %v2049_v52 }
0x1a14   :  { %2075 = vst.msk [vmem:[%s3443_s8 + $0x10] sm:$0xff] %vm2072_vm4, %v2044_v50  ;;  %v2559_v8 = vpop.f32.mrb[26].mxu0 }
0x1a15   :  { %v2059_v51 = vadd.f32 %v2559_v8, %v2144_v49  ;;  %v2053_v58 = vpop.f32.mrb[27].mxu0 }
0x1a16   :  { %v2054_v59 = vadd.f32 %v2144_v49, %v2053_v58 }
0x1a17   :  { %2078 = vst.msk [vmem:[%s3443_s8 + $0x28] sm:$0xff] %vm2072_vm4, %v2059_v51 }
0x1a18   :  { %2077 = vst.msk [vmem:[%s3443_s8 + $0x20] sm:$0xff] %vm2072_vm4, %v2054_v59 }
0x1a7d   :  { %v2562_v60 = vpop.f32.mrb[28].mxu0 }
0x1a7e   :  { %v2069_v62 = vadd.f32 %v2562_v60, %v2144_v49  ;;  %v2063_v2 = vpop.f32.mrb[29].mxu0 }
0x1a7f   :  { %v2064_v3 = vadd.f32 %v2144_v49, %v2063_v2 }
0x1a80   :  { %2080 = vst.msk [vmem:[%s3443_s8 + $0x38] sm:$0xff] %vm2072_vm4, %v2069_v62 }
0x1a81   :  { %2079 = vst.msk [vmem:[%s3443_s8 + $0x30] sm:$0xff] %vm2072_vm4, %v2064_v3 }
0x1a82   :  { %2085 = vsyncpa [#allocation5], 1 }
0x1a83   :  { %2086 = vsyncpa [#allocation7], 1 }

</bundles_post_ra>
